<compile_context>
chip_gen: v5e
topology: v5e:2x2
jax: 0.10.0
libtpu: 0.0.40
codegen_flags: <defaults>
</compile_context>

<pallas_src>
import functools

import jax
import jax.numpy as jnp
from jax.experimental import pallas as pl
from jax.experimental.pallas import tpu as pltpu

D_IN, D_H1, D_H2, D_H3 = 18, 50, 120, 32


def _sigmoid(z):
    # sigmoid(z) == 0.5 * tanh(0.5 * z) + 0.5 : single EUP op + cheap VPU ops.
    return 0.5 * jnp.tanh(0.5 * z) + 0.5


def _mlp_kernel(xt_ref, w1_ref, b1_ref, w2_ref, b2_ref, w3_ref, b3_ref,
                w4_ref, b4_ref, o_ref):
    # Feature-major layout. Shapes per grid step:
    #   xt_ref: (18, TB) f32        w1_ref: (50, 18)  bf16   b1_ref: (50, 1)  f32
    #   w2_ref: (120, 50) bf16      b2_ref: (120, 1)  f32
    #   w3_ref: (32, 120) bf16      b3_ref: (32, 1)   f32
    #   w4_ref: (1, 32)   bf16      b4_ref: (1, 1)    f32
    #   o_ref:  (1, TB)   f32   (lane-dense output row)
    x = xt_ref[...].astype(jnp.bfloat16)                               # (18, TB)

    # Linear(18, 50) -> Dropout (identity in eval) -> Sigmoid
    h = jnp.dot(w1_ref[...], x, preferred_element_type=jnp.float32) + b1_ref[...]
    h = _sigmoid(h)                                                    # (50, TB)

    # Linear(50, 120) -> Sigmoid
    h = jnp.dot(w2_ref[...], h.astype(jnp.bfloat16),
                preferred_element_type=jnp.float32) + b2_ref[...]
    h = _sigmoid(h)                                                    # (120, TB)

    # Linear(120, 32) -> Sigmoid
    h = jnp.dot(w3_ref[...], h.astype(jnp.bfloat16),
                preferred_element_type=jnp.float32) + b3_ref[...]
    h = _sigmoid(h)                                                    # (32, TB)

    # Linear(32, 1) -> Sigmoid, produced directly in lane-dense (1, TB) layout.
    y = jnp.dot(w4_ref[...], h.astype(jnp.bfloat16),
                preferred_element_type=jnp.float32) + b4_ref[...]
    o_ref[...] = _sigmoid(y)                                           # (1, TB)


def prepare_params(w1, b1, w2, b2, w3, b3, w4, b4):
    """One-time prep (outside the hot path).

    Weights stay in PyTorch (out, in) layout (used directly as matmul LHS in
    the feature-major kernel) and are stored bf16 for native MXU rate; biases
    become (out, 1) f32 columns that broadcast over the batch lanes.
    """
    bf16, f32 = jnp.bfloat16, jnp.float32
    return (
        jnp.asarray(w1, f32).astype(bf16), jnp.asarray(b1, f32)[:, None],  # (50,18),(50,1)
        jnp.asarray(w2, f32).astype(bf16), jnp.asarray(b2, f32)[:, None],  # (120,50),(120,1)
        jnp.asarray(w3, f32).astype(bf16), jnp.asarray(b3, f32)[:, None],  # (32,120),(32,1)
        jnp.asarray(w4, f32).astype(bf16), jnp.asarray(b4, f32)[:, None],  # (1,32),(1,1)
    )


def _round_up(n, m):
    return ((n + m - 1) // m) * m


@functools.partial(jax.jit, static_argnames=("block_b",))
def multi_channel_attack_forward(x, params, *, block_b=2048):
    """x: (B, 18) float. params: output of prepare_params(). Returns (B, 1) f32."""
    w1, b1, w2, b2, w3, b3, w4, b4 = params
    B = x.shape[0]

    # Batch tile: multiple of 128 so every (features, TB) intermediate and the
    # (1, TB) output block are lane-dense.
    tb = min(_round_up(block_b, 128), _round_up(max(B, 1), 128))
    # v7x has 2 TensorCores: keep at least 2 grid steps when the batch allows.
    if pl.cdiv(B, tb) < 2 and tb >= 256:
        tb = _round_up(tb // 2, 128)
    n_tiles = pl.cdiv(B, tb)

    # Feature-major input (18, B): per-tile DMA is 18 contiguous rows of 4*tb
    # bytes. No bf16 copy and no jnp.pad: the ragged last tile is covered by a
    # Pallas edge block; its padded columns compute harmless finite values that
    # never reach the (1, B) output (contractions are over features only).
    xt = x.astype(jnp.float32).T

    flops = 2 * B * (D_IN * D_H1 + D_H1 * D_H2 + D_H2 * D_H3 + D_H3)
    transcendentals = B * (D_H1 + D_H2 + D_H3 + 1)
    bytes_accessed = (B * D_IN * 4 + B * 4
                      + sum(int(p.size) * p.dtype.itemsize for p in params))

    def resident(a):  # whole-array block, same for every grid step
        return pl.BlockSpec(a.shape, lambda i: (0, 0))

    out = pl.pallas_call(
        _mlp_kernel,
        out_shape=jax.ShapeDtypeStruct((1, B), jnp.float32),
        grid=(n_tiles,),
        in_specs=[
            pl.BlockSpec((D_IN, tb), lambda i: (0, i)),
            resident(w1), resident(b1),
            resident(w2), resident(b2),
            resident(w3), resident(b3),
            resident(w4), resident(b4),
        ],
        out_specs=pl.BlockSpec((1, tb), lambda i: (0, i)),
        compiler_params=pltpu.CompilerParams(
            dimension_semantics=("parallel",)),
        cost_estimate=pl.CostEstimate(
            flops=flops,
            transcendentals=transcendentals,
            bytes_accessed=bytes_accessed),
    )(xt, w1, b1, w2, b2, w3, b3, w4, b4)

    return out[0, :, None]


def _init_params(key):
    """Deterministic params in PyTorch nn.Linear layout (weight: [out, in])."""
    ks = jax.random.split(key, 8)

    def linear(kw, kb, fan_in, fan_out):
        bound = 1.0 / jnp.sqrt(float(fan_in))
        w = jax.random.uniform(kw, (fan_out, fan_in), jnp.float32, -bound, bound)
        b = jax.random.uniform(kb, (fan_out,), jnp.float32, -bound, bound)
        return w, b

    w1, b1 = linear(ks[0], ks[1], D_IN, D_H1)
    w2, b2 = linear(ks[2], ks[3], D_H1, D_H2)
    w3, b3 = linear(ks[4], ks[5], D_H2, D_H3)
    w4, b4 = linear(ks[6], ks[7], D_H3, 1)
    return w1, b1, w2, b2, w3, b3, w4, b4


if __name__ == "__main__":
    key = jax.random.PRNGKey(0)
    k_x, k_p = jax.random.split(key)

    B = 300  # non-multiple of the tile: exercises the ragged edge block + grid
    x = jax.random.normal(k_x, (B, D_IN), jnp.float32)

    raw = _init_params(k_p)              # PyTorch-layout weights/biases (f32)
    params = prepare_params(*raw)        # kernel layout (hoisted out of hot path)

    out = multi_channel_attack_forward(x, params)
    out = jax.block_until_ready(out)
    assert out.shape == (B, 1), out.shape

    w1, b1, w2, b2, w3, b3, w4, b4 = raw

    # Reference A: mirrors the kernel numerics exactly (bf16 MXU operands,
    # f32 accumulation) -> tight tolerance.
    def mm(a, w):
        return jnp.dot(a.astype(jnp.bfloat16), w.astype(jnp.bfloat16).T,
                       preferred_element_type=jnp.float32)

    h = jax.nn.sigmoid(mm(x, w1) + b1)
    h = jax.nn.sigmoid(mm(h, w2) + b2)
    h = jax.nn.sigmoid(mm(h, w3) + b3)
    ref_bf16 = jax.nn.sigmoid(mm(h, w4) + b4)
    err_bf16 = float(jnp.max(jnp.abs(out - ref_bf16)))
    assert jnp.allclose(out, ref_bf16, atol=5e-4, rtol=0), err_bf16

    # Reference B: pure f32 PyTorch-equivalent forward -> bounds the bf16
    # operand quantization error (f32 accumulation keeps it small).
    h = jax.nn.sigmoid(x @ w1.T + b1)
    h = jax.nn.sigmoid(h @ w2.T + b2)
    h = jax.nn.sigmoid(h @ w3.T + b3)
    ref_f32 = jax.nn.sigmoid(h @ w4.T + b4)
    err_f32 = float(jnp.max(jnp.abs(out - ref_f32)))
    assert jnp.allclose(out, ref_f32, atol=1e-2, rtol=0), err_f32

    print("KERNEL_OK")
</pallas_src>

<mosaic_0001>
module attributes {stable_mosaic.version = 11 : i64} {
  func.func @_mlp_kernel(%arg0: i32, %arg1: memref<18x256xf32, #tpu.memory_space<vmem>>, %arg2: memref<50x18xbf16, #tpu.memory_space<vmem>>, %arg3: memref<50x1xf32, #tpu.memory_space<vmem>>, %arg4: memref<120x50xbf16, #tpu.memory_space<vmem>>, %arg5: memref<120x1xf32, #tpu.memory_space<vmem>>, %arg6: memref<32x120xbf16, #tpu.memory_space<vmem>>, %arg7: memref<32x1xf32, #tpu.memory_space<vmem>>, %arg8: memref<1x32xbf16, #tpu.memory_space<vmem>>, %arg9: memref<1x1xf32, #tpu.memory_space<vmem>>, %arg10: memref<1x256xf32, #tpu.memory_space<vmem>>) attributes {dimension_semantics = [#tpu.dimension_semantics<parallel>], iteration_bounds = array<i64: 2>, scalar_prefetch = 0 : i64, scratch_operands = 0 : i64, tpu.core_type = #tpu.core_type<tc>, window_params = [{transform_indices = @transform_0, window_bounds = array<i64: 18, 256>}, {pipeline_mode = #tpu.pipeline_mode<synchronous>, transform_indices = @transform_1, window_bounds = array<i64: 50, 18>}, {pipeline_mode = #tpu.pipeline_mode<synchronous>, transform_indices = @transform_2, window_bounds = array<i64: 50, 1>}, {pipeline_mode = #tpu.pipeline_mode<synchronous>, transform_indices = @transform_3, window_bounds = array<i64: 120, 50>}, {pipeline_mode = #tpu.pipeline_mode<synchronous>, transform_indices = @transform_4, window_bounds = array<i64: 120, 1>}, {pipeline_mode = #tpu.pipeline_mode<synchronous>, transform_indices = @transform_5, window_bounds = array<i64: 32, 120>}, {pipeline_mode = #tpu.pipeline_mode<synchronous>, transform_indices = @transform_6, window_bounds = array<i64: 32, 1>}, {pipeline_mode = #tpu.pipeline_mode<synchronous>, transform_indices = @transform_7, window_bounds = array<i64: 1, 32>}, {pipeline_mode = #tpu.pipeline_mode<synchronous>, transform_indices = @transform_8, window_bounds = array<i64: 1, 1>}, {transform_indices = @transform_9, window_bounds = array<i64: 1, 256>}]} {
    %c0 = arith.constant 0 : index
    %c0_0 = arith.constant 0 : index
    %0 = vector.load %arg1[%c0, %c0_0] : memref<18x256xf32, #tpu.memory_space<vmem>>, vector<18x256xf32>
    %1 = arith.truncf %0 : vector<18x256xf32> to vector<18x256xbf16>
    %c0_1 = arith.constant 0 : index
    %c0_2 = arith.constant 0 : index
    %2 = vector.load %arg2[%c0_1, %c0_2] : memref<50x18xbf16, #tpu.memory_space<vmem>>, vector<50x18xbf16>
    %cst = arith.constant dense<0.000000e+00> : vector<50x256xf32>
    %3 = tpu.matmul %2, %1, %cst {dimension_numbers = #tpu.dot_dimension_numbers<[1], [0], [0], [1], [0, 0, 1, 1], [], []>} : vector<50x18xbf16>, vector<18x256xbf16>, vector<50x256xf32> -> vector<50x256xf32>
    %c0_3 = arith.constant 0 : index
    %c0_4 = arith.constant 0 : index
    %4 = vector.load %arg3[%c0_3, %c0_4] : memref<50x1xf32, #tpu.memory_space<vmem>>, vector<50x1xf32>
    %5 = vector.broadcast %4 : vector<50x1xf32> to vector<50x256xf32>
    %6 = arith.addf %3, %5 : vector<50x256xf32>
    %cst_5 = arith.constant 5.000000e-01 : f32
    %7 = vector.broadcast %cst_5 : f32 to vector<50x256xf32>
    %8 = arith.mulf %7, %6 : vector<50x256xf32>
    %9 = math.tanh %8 : vector<50x256xf32>
    %cst_6 = arith.constant 5.000000e-01 : f32
    %10 = vector.broadcast %cst_6 : f32 to vector<50x256xf32>
    %11 = arith.mulf %10, %9 : vector<50x256xf32>
    %cst_7 = arith.constant 5.000000e-01 : f32
    %12 = vector.broadcast %cst_7 : f32 to vector<50x256xf32>
    %13 = arith.addf %11, %12 : vector<50x256xf32>
    %c0_8 = arith.constant 0 : index
    %c0_9 = arith.constant 0 : index
    %14 = vector.load %arg4[%c0_8, %c0_9] : memref<120x50xbf16, #tpu.memory_space<vmem>>, vector<120x50xbf16>
    %15 = arith.truncf %13 : vector<50x256xf32> to vector<50x256xbf16>
    %cst_10 = arith.constant dense<0.000000e+00> : vector<120x256xf32>
    %16 = tpu.matmul %14, %15, %cst_10 {dimension_numbers = #tpu.dot_dimension_numbers<[1], [0], [0], [1], [0, 0, 1, 1], [], []>} : vector<120x50xbf16>, vector<50x256xbf16>, vector<120x256xf32> -> vector<120x256xf32>
    %c0_11 = arith.constant 0 : index
    %c0_12 = arith.constant 0 : index
    %17 = vector.load %arg5[%c0_11, %c0_12] : memref<120x1xf32, #tpu.memory_space<vmem>>, vector<120x1xf32>
    %18 = vector.broadcast %17 : vector<120x1xf32> to vector<120x256xf32>
    %19 = arith.addf %16, %18 : vector<120x256xf32>
    %cst_13 = arith.constant 5.000000e-01 : f32
    %20 = vector.broadcast %cst_13 : f32 to vector<120x256xf32>
    %21 = arith.mulf %20, %19 : vector<120x256xf32>
    %22 = math.tanh %21 : vector<120x256xf32>
    %cst_14 = arith.constant 5.000000e-01 : f32
    %23 = vector.broadcast %cst_14 : f32 to vector<120x256xf32>
    %24 = arith.mulf %23, %22 : vector<120x256xf32>
    %cst_15 = arith.constant 5.000000e-01 : f32
    %25 = vector.broadcast %cst_15 : f32 to vector<120x256xf32>
    %26 = arith.addf %24, %25 : vector<120x256xf32>
    %c0_16 = arith.constant 0 : index
    %c0_17 = arith.constant 0 : index
    %27 = vector.load %arg6[%c0_16, %c0_17] : memref<32x120xbf16, #tpu.memory_space<vmem>>, vector<32x120xbf16>
    %28 = arith.truncf %26 : vector<120x256xf32> to vector<120x256xbf16>
    %cst_18 = arith.constant dense<0.000000e+00> : vector<32x256xf32>
    %29 = tpu.matmul %27, %28, %cst_18 {dimension_numbers = #tpu.dot_dimension_numbers<[1], [0], [0], [1], [0, 0, 1, 1], [], []>} : vector<32x120xbf16>, vector<120x256xbf16>, vector<32x256xf32> -> vector<32x256xf32>
    %c0_19 = arith.constant 0 : index
    %c0_20 = arith.constant 0 : index
    %30 = vector.load %arg7[%c0_19, %c0_20] : memref<32x1xf32, #tpu.memory_space<vmem>>, vector<32x1xf32>
    %31 = vector.broadcast %30 : vector<32x1xf32> to vector<32x256xf32>
    %32 = arith.addf %29, %31 : vector<32x256xf32>
    %cst_21 = arith.constant 5.000000e-01 : f32
    %33 = vector.broadcast %cst_21 : f32 to vector<32x256xf32>
    %34 = arith.mulf %33, %32 : vector<32x256xf32>
    %35 = math.tanh %34 : vector<32x256xf32>
    %cst_22 = arith.constant 5.000000e-01 : f32
    %36 = vector.broadcast %cst_22 : f32 to vector<32x256xf32>
    %37 = arith.mulf %36, %35 : vector<32x256xf32>
    %cst_23 = arith.constant 5.000000e-01 : f32
    %38 = vector.broadcast %cst_23 : f32 to vector<32x256xf32>
    %39 = arith.addf %37, %38 : vector<32x256xf32>
    %c0_24 = arith.constant 0 : index
    %c0_25 = arith.constant 0 : index
    %40 = vector.load %arg8[%c0_24, %c0_25] : memref<1x32xbf16, #tpu.memory_space<vmem>>, vector<1x32xbf16>
    %41 = arith.truncf %39 : vector<32x256xf32> to vector<32x256xbf16>
    %cst_26 = arith.constant dense<0.000000e+00> : vector<1x256xf32>
    %42 = tpu.matmul %40, %41, %cst_26 {dimension_numbers = #tpu.dot_dimension_numbers<[1], [0], [0], [1], [0, 0, 1, 1], [], []>} : vector<1x32xbf16>, vector<32x256xbf16>, vector<1x256xf32> -> vector<1x256xf32>
    %c0_27 = arith.constant 0 : index
    %c0_28 = arith.constant 0 : index
    %43 = vector.load %arg9[%c0_27, %c0_28] : memref<1x1xf32, #tpu.memory_space<vmem>>, vector<1x1xf32>
    %44 = vector.broadcast %43 : vector<1x1xf32> to vector<1x256xf32>
    %45 = arith.addf %42, %44 : vector<1x256xf32>
    %cst_29 = arith.constant 5.000000e-01 : f32
    %46 = vector.broadcast %cst_29 : f32 to vector<1x256xf32>
    %47 = arith.mulf %46, %45 : vector<1x256xf32>
    %48 = math.tanh %47 : vector<1x256xf32>
    %cst_30 = arith.constant 5.000000e-01 : f32
    %49 = vector.broadcast %cst_30 : f32 to vector<1x256xf32>
    %50 = arith.mulf %49, %48 : vector<1x256xf32>
    %cst_31 = arith.constant 5.000000e-01 : f32
    %51 = vector.broadcast %cst_31 : f32 to vector<1x256xf32>
    %52 = arith.addf %50, %51 : vector<1x256xf32>
    %c0_32 = arith.constant 0 : index
    %c0_33 = arith.constant 0 : index
    %53 = vector.load %arg10[%c0_32, %c0_33] : memref<1x256xf32, #tpu.memory_space<vmem>>, vector<1x256xf32>
    tpu.vector_store %arg10[%c0_32, %c0_33], %52 {strides = array<i32>} : memref<1x256xf32, #tpu.memory_space<vmem>>, vector<1x256xf32>,
    return
  }
  func.func @transform_0(%arg0: i32) -> (i32, i32) {
    %c0_i32 = arith.constant 0 : i32
    %c0_i32_0 = arith.constant 0 : i32
    return %c0_i32, %arg0 : i32, i32
  }
  func.func @transform_1(%arg0: i32) -> (i32, i32) {
    %c0_i32 = arith.constant 0 : i32
    %c0_i32_0 = arith.constant 0 : i32
    %c0_i32_1 = arith.constant 0 : i32
    return %c0_i32, %c0_i32_0 : i32, i32
  }
  func.func @transform_2(%arg0: i32) -> (i32, i32) {
    %c0_i32 = arith.constant 0 : i32
    %c0_i32_0 = arith.constant 0 : i32
    %c0_i32_1 = arith.constant 0 : i32
    return %c0_i32, %c0_i32_0 : i32, i32
  }
  func.func @transform_3(%arg0: i32) -> (i32, i32) {
    %c0_i32 = arith.constant 0 : i32
    %c0_i32_0 = arith.constant 0 : i32
    %c0_i32_1 = arith.constant 0 : i32
    return %c0_i32, %c0_i32_0 : i32, i32
  }
  func.func @transform_4(%arg0: i32) -> (i32, i32) {
    %c0_i32 = arith.constant 0 : i32
    %c0_i32_0 = arith.constant 0 : i32
    %c0_i32_1 = arith.constant 0 : i32
    return %c0_i32, %c0_i32_0 : i32, i32
  }
  func.func @transform_5(%arg0: i32) -> (i32, i32) {
    %c0_i32 = arith.constant 0 : i32
    %c0_i32_0 = arith.constant 0 : i32
    %c0_i32_1 = arith.constant 0 : i32
    return %c0_i32, %c0_i32_0 : i32, i32
  }
  func.func @transform_6(%arg0: i32) -> (i32, i32) {
    %c0_i32 = arith.constant 0 : i32
    %c0_i32_0 = arith.constant 0 : i32
    %c0_i32_1 = arith.constant 0 : i32
    return %c0_i32, %c0_i32_0 : i32, i32
  }
  func.func @transform_7(%arg0: i32) -> (i32, i32) {
    %c0_i32 = arith.constant 0 : i32
    %c0_i32_0 = arith.constant 0 : i32
    %c0_i32_1 = arith.constant 0 : i32
    return %c0_i32, %c0_i32_0 : i32, i32
  }
  func.func @transform_8(%arg0: i32) -> (i32, i32) {
    %c0_i32 = arith.constant 0 : i32
    %c0_i32_0 = arith.constant 0 : i32
    %c0_i32_1 = arith.constant 0 : i32
    return %c0_i32, %c0_i32_0 : i32, i32
  }
  func.func @transform_9(%arg0: i32) -> (i32, i32) {
    %c0_i32 = arith.constant 0 : i32
    %c0_i32_0 = arith.constant 0 : i32
    return %c0_i32, %arg0 : i32, i32
  }
}

</mosaic_0001>

<bundles_post_ra>
// kernel: multi_channel_attack_forward.1
= control target key start
LH: loop header
LB: loop body
LE: loop exit
PB: predicated region body
PF: predicated region fallthrough
CT: control target
= control target key end

     0   :  { %s2914_s0 = inlined_call_operand.vmem [shape: f32[18,300], index: 0, kind: input, shape index: {}]   ;;  %s2915_s1 = inlined_call_operand.vmem [shape: bf16[50,18], index: 1, kind: input, shape index: {}]   ;;  %s2916_s2 = inlined_call_operand.vmem [shape: f32[50,1], index: 2, kind: input, shape index: {}]   ;;  %s2917_s3 = inlined_call_operand.vmem [shape: bf16[120,50], index: 3, kind: input, shape index: {}]   ;;  %s2918_s4 = inlined_call_operand.vmem [shape: f32[120,1], index: 4, kind: input, shape index: {}]   ;;  %s2919_s5 = inlined_call_operand.vmem [shape: bf16[32,120], index: 5, kind: input, shape index: {}]   ;;  %s2920_s6 = inlined_call_operand.vmem [shape: f32[32,1], index: 6, kind: input, shape index: {}]   ;;  %s2921_s7 = inlined_call_operand.vmem [shape: bf16[1,32], index: 7, kind: input, shape index: {}]   ;;  %s2922_s8 = inlined_call_operand.<no memory space> [shape: f32[1,1], index: 8, kind: input, shape index: {}]   ;;  %s2923_s9 = inlined_call_operand.hbm [shape: f32[1,300], index: 9, kind: output, shape index: {}]  }
   0x1   :  { %2929 = sst [smem:[#allocation11_spill]] %s2914_s0  ;;  %v14_v0 = vstv %s2922_s8 }
   0x2   :  { %15 = vst [vmem:[#allocation2] sm:$0x1] %v14_v0 }
   0x3   :  { %16 = vsyncpa [#allocation5], 0 }
   0x4   :  { %18 = vsyncpa [#allocation5 + $0x1], 0  ;;  %s2303_s11 = smov 0   ;;  %s2305_s12 = smov 0  }
   0x5   :  { %s2307_s13 = smov 0   ;;  %s2309_s14 = smov 0  }
   0x6 LB: > { %2930 = sst [smem:[#allocation7_spill]] %s2176_s13  ;;  %s2924_s8 = sadd.s32 4294967295, %s2180_s14   ;;  %s2180_s14 = sphi %s2309_s14, %s2951_s14   ;;  %s2176_s13 = sphi %s2307_s13, %s2953_s13   ;;  %s2172_s12 = sphi %s2305_s12, %s2955_s12   ;;  %s2168_s11 = sphi %s2303_s11, %s2954_s11  }
   0x7   : > { %s1625_s15 = sadd.s32 4294967294, %s2180_s14   ;;  %s2326_s16 = sadd.s32 1, %s2180_s14  }
   0x8   : > { %2931 = sst [smem:[#allocation8_spill]] %s2326_s16  ;;  %s31_s17 = sadd.s32 1, %s2176_s13 }
   0x9   : > { %s28_s18 = ssub.s32 %s2180_s14, %s2326_s16  ;;  %p38_p0 = scmp.ne.s32.totalorder %s2176_s13, %s2172_s12 }
   0xa   : > { %p29_p1 = scmp.eq.s32.totalorder %s28_s18, 0  ;;  %p39_p2 = scmp.eq.s32.totalorder %s2180_s14, 0 }
   0xb   : > { %p236_p3 = scmp.eq.s32.totalorder %s2924_s8, 1  ;;  %p241_p4 = scmp.ne.s32.totalorder %s2172_s12, %s2168_s11 }
   0xc   : > { %s2339_s19 = scalar_select %p29_p1, %s2176_s13, %s31_s17  }
   0xd   : > { %p40_p5 = por %p39_p2, %p38_p0  ;;  %p2341_p6 = por %p236_p3, %p38_p0 }
   0xe   : > { %2932 = sst [smem:[#allocation9_spill]] %s2339_s19  ;;  %p242_p7 = scmp.eq.s32.totalorder %s1625_s15, 1 }
   0xf   : > { %p1627_p9 = scmp.ge.s32.totalorder %s2180_s14, 2 }
  0x10   : > { %p2345_p8 = por %p242_p7, %p241_p4 }
  0x11   : > { %282 = sbr.rel (%p1627_p9) target bundleno = 183 (0xb7), region = 48 }
  0x12   : > { %s2934_s21 = scalar_select %p2345_p8, 1, 0 }
  0x14   : > { %2935 = sst [smem:[#allocation10_spill]] %s2934_s21 }
  0x16   : > { %285 = sbr.rel (!%p40_p5) target bundleno = 183 (0xb7), region = 52  ;;  %s287_s22 = sand.u32 (%p40_p5), 1, %s2176_s13  }
  0x17   : > { %s1628_s23 = sshll.u32 (%p40_p5), %s2180_s14, 1  ;;  %s1747_s24 = smul.u32 (%p40_p5), 48, %s287_s22 }
  0x18   : > { %s291_s25 = ssub.s32 (%p40_p5), 3, %s1628_s23  ;;  %s1734_s26 = sshll.u32 (%p40_p5), %s2180_s14, 4 }
  0x19   : > { %p292_p10 = scmp.lt.s32.totalorder (%p40_p5), %s291_s25, 2  ;;  %s2936_s0 = sld [smem:[#allocation11_spill]] (%p40_p5) }
  0x1a   : > { %s2362_s15 = scalar_lea.vmem (%p40_p5), [#allocation3], %s1747_s24  }
  0x1b   : > { %s2957_s25 = smov (!%p292_p10, %s291_s25), 2 }
  0x1c   : > { %s294_s30 = smul.u32 24, %s2957_s25  ;;  %s2360_s10 = sshll.u32 %s2957_s25, 3 }
  0x1e   : > { %p1632_p11 = scmp.eq.s32.totalorder %s294_s30, 0 }
  0x1f   : > { %s2358_s29 = scalar_lea.vmem %s2936_s0, %s1734_s26   ;;  %p302_p12 = scmp.lt.u32.totalorder (!%p1632_p11), %s2360_s10, 8 }
  0x20   : > { %301 = sbr.rel (%p1632_p11) target bundleno = 183 (0xb7), region = 56 }
  0x25   : > { %305 = sbr.rel (%p302_p12) target bundleno = 172 (0xac), region = 60  ;;  %s2366_s17 = sand.u32 (!%p302_p12), 7, %s2360_s10  }
  0x26   : > { %p326_p13 = scmp.eq.s32.totalorder (!%p302_p12), %s2366_s17, 0  ;;  %p1633_p0 = scmp.ne.s32.totalorder (!%p302_p12), %s2366_s17, 0 }
  0x2a   : > { %329 = sbr.rel (%p1633_p0) target bundleno = 103 (0x67), region = 75  ;;  %s330_s18 = sshrl.u32 (!%p1633_p0), %s2360_s10, 3 }
  0x2b   : > { %1920 = sdivrem.u32 (!%p1633_p0), %s330_s18, 12 }
  0x34   : > { %s2373_s22 = spop.drf %1920 }
  0x35   : > { %s1922_s23 = spop.drf %1920  ;;  %p1634_p1 = scmp.le.s32.totalorder %s2373_s22, 0 }
  0x36   : > { %s2937_s24 = smov (!%p1634_p1), %s2362_s15  ;;  %s2938_s25 = smov (!%p1634_p1), %s2358_s29 }
  0x37   : > { %1553 = sbr.rel (%p1634_p1) target bundleno = 77 (0x4d), region = 174  ;;  %s2382_s26 = smov (!%p1634_p1), 0  }
  0x38   : > { %s2384_s27 = smov (!%p1634_p1), 0  }
  0x3c LB: >> { %v354_v1 = vld [vmem:[%s2188_s25 + $0x30] sm:$0xff]  ;;  %v356_v2 = vld [vmem:[%s2188_s25 + $0x38] sm:$0xff]  ;;  %s414_s28 = sadd.s32 1, %s2192_s26  ;;  %v342_v4 = vld [vmem:[%s2188_s25] sm:$0xff]  ;;  %s336_s27 = sadd.s32 1, %s2196_s27   ;;  %s2196_s27 = sphi %s2384_s27, %s336_s27   ;;  %s2192_s26 = sphi %s2382_s26, %s2941_s26   ;;  %s2188_s25 = sphi %s2938_s25, %s2940_s25   ;;  %s2184_s24 = sphi %s2937_s24, %s2939_s24  }
  0x3d   : >> { %391 = vst [vmem:[%s2184_s24 + $0x20] sm:$0xff] %v354_v1  ;;  %v348_v3 = vld [vmem:[%s2188_s25 + $0x18] sm:$0xff]  ;;  %v344_v5 = vld [vmem:[%s2188_s25 + $0x8] sm:$0xff]  ;;  %p415_p2 = scmp.ge.s32.totalorder %s414_s28, %s2373_s22  ;;  %v358_v6 = vld [vmem:[%s2188_s25 + $0x40] sm:$0xff]  ;;  %p335_p3 = scmp.ge.s32.totalorder %s336_s27, %s2373_s22 }
  0x3e   : >> { %393 = vst [vmem:[%s2184_s24 + $0x28] sm:$0xff] %v356_v2  ;;  %v368_v7 = vld [vmem:[%s2188_s25 + $0x20] sm:$0xff]  ;;  %v360_v8 = vld [vmem:[%s2188_s25 + $0x48] sm:$0xff]  ;;  %v362_v9 = vld [vmem:[%s2188_s25 + $0x50] sm:$0xff] }
  0x3f   : >> { %367 = vst [vmem:[%s2184_s24 + $0x10] sm:$0xff] %v348_v3  ;;  %s2959_s28 = smov (%p415_p2, %s414_s28), 0  ;;  %v364_v10 = vld [vmem:[%s2188_s25 + $0x58] sm:$0xff]  ;;  %v384_v11 = vld [vmem:[%s2188_s25 + $0x60] sm:$0xff]  ;;  %v386_v12 = vld [vmem:[%s2188_s25 + $0x68] sm:$0xff] }
  0x40   : >> { %343 = vst [vmem:[%s2184_s24] sm:$0xff] %v342_v4  ;;  %s417_s30 = smul.u32 96, %s2959_s28  ;;  %v388_v13 = vld [vmem:[%s2188_s25 + $0x70] sm:$0xff]  ;;  %v408_v14 = vld [vmem:[%s2188_s25 + $0x78] sm:$0xff]  ;;  %v410_v15 = vld [vmem:[%s2188_s25 + $0x80] sm:$0xff] }
  0x41   : >> { %345 = vst [vmem:[%s2184_s24 + $0x8] sm:$0xff] %v344_v5  ;;  %v412_v16 = vld [vmem:[%s2188_s25 + $0x88] sm:$0xff] }
  0x42   : >> { %369 = vst [vmem:[%s2184_s24 + $0x18] sm:$0xff] %v368_v7  ;;  %s419_s23 = scalar_lea.vmem %s2358_s29, %s417_s30   ;;  %s420_s26 = scalar_lea.vmem %s2362_s15, %s417_s30 [#allocation3]  }
  0x43   : >> { %395 = vst [vmem:[%s2184_s24 + $0x30] sm:$0xff] %v358_v6  ;;  %s2940_s25 = smov %s419_s23 }
  0x44   : >> { %397 = vst [vmem:[%s2184_s24 + $0x38] sm:$0xff] %v360_v8 }
  0x45   : >> { %399 = vst [vmem:[%s2184_s24 + $0x40] sm:$0xff] %v362_v9 }
  0x46   : >> { %401 = vst [vmem:[%s2184_s24 + $0x48] sm:$0xff] %v364_v10 }
  0x47   : >> { %403 = vst [vmem:[%s2184_s24 + $0x50] sm:$0xff] %v384_v11 }
  0x48   : >> { %405 = vst [vmem:[%s2184_s24 + $0x58] sm:$0xff] %v386_v12  ;;  %338 = sbr.rel (!%p335_p3) target bundleno = 60 (0x3c), region = 180 }
  0x49   : >> { %407 = vst [vmem:[%s2184_s24 + $0x60] sm:$0xff] %v388_v13 }
  0x4a   : >> { %409 = vst [vmem:[%s2184_s24 + $0x68] sm:$0xff] %v408_v14 }
  0x4b   : >> { %411 = vst [vmem:[%s2184_s24 + $0x70] sm:$0xff] %v410_v15 }
  0x4c   : >> { %413 = vst [vmem:[%s2184_s24 + $0x78] sm:$0xff] %v412_v16  ;;  %s2939_s24 = smov %s420_s26  ;;  %s2941_s26 = smov %s2959_s28 }
  0x4d PF: > { %1923 = sdivrem.u32 %s330_s18, 12 }
  0x4e   : > { %s1635_s30 = smul.u32 96, %s2373_s22 }
  0x50   : > { %s2445_s8 = scalar_lea.vmem %s2358_s29, %s1635_s30   ;;  %s2448_s0 = scalar_lea.vmem %s2362_s15, %s1635_s30 [#allocation3]  }
  0x56   : > { %s1924_s19 = spop.drf %1923 }
  0x57   : > { %s2450_s13 = spop.drf %1923 }
  0x58   : > { %p1637_p4 = scmp.le.s32.totalorder %s2450_s13, 0 }
  0x59   : > { %s2942_s24 = smov (!%p1637_p4), %s2448_s0  ;;  %s2202_s25 = smov (!%p1637_p4), %s2445_s8  }
  0x5a   : > { %1567 = sbr.rel (%p1637_p4) target bundleno = 103 (0x67), region = 185  ;;  %s2206_s27 = smov (!%p1637_p4), 0  }
  0x5b   : > { %s2210_s28 = smov (!%p1637_p4), 0  }
  0x5f LB: >> { %v437_v17 = vld [vmem:[%s2204_s25] sm:$0xff]  ;;  %v439_v18 = vld [vmem:[%s2204_s25 + $0x18] sm:$0xff]  ;;  %v441_v19 = vld [vmem:[%s2204_s25 + $0x30] sm:$0xff]  ;;  %s443_s19 = sadd.s32 1, %s2208_s27  ;;  %s431_s28 = sadd.s32 1, %s2212_s28   ;;  %s2212_s28 = sphi %s2210_s28, %s431_s28   ;;  %s2208_s27 = sphi %s2206_s27, %s2207_s27   ;;  %s2204_s25 = sphi %s2202_s25, %s448_s25   ;;  %s2200_s24 = sphi %s2942_s24, %s449_s24  }
  0x60   : >> { %438 = vst [vmem:[%s2200_s24] sm:$0xff] %v437_v17  ;;  %p444_p5 = scmp.ge.s32.totalorder %s443_s19, %s2450_s13  ;;  %p430_p7 = scmp.ge.s32.totalorder %s431_s28, %s2450_s13 }
  0x61   : >> { %440 = vst [vmem:[%s2200_s24 + $0x10] sm:$0xff] %v439_v18 }
  0x62   : >> { %442 = vst [vmem:[%s2200_s24 + $0x20] sm:$0xff] %v441_v19  ;;  %s2961_s19 = smov (%p444_p5, %s443_s19), 0  ;;  %433 = sbr.rel (!%p430_p7) target bundleno = 95 (0x5f), region = 191 }
  0x63   : >> { %s1638_s18 = sshll.u32 %s2961_s19, 3  ;;  %s2207_s27 = smov %s2961_s19  }
  0x64   : >> { %s448_s25 = scalar_lea.vmem %s2445_s8, %s1638_s18   ;;  %s449_s24 = scalar_lea.vmem %s2448_s0, %s1638_s18 [#allocation3]  }
  0x67 PF: > { %452 = sbr.rel (%p326_p13) target bundleno = 172 (0xac), region = 93  ;;  %s454_s22 = ssub.s32 (!%p326_p13), %s2360_s10, %s2366_s17 }
  0x68   : > { %s458_s23 = sshrl.u32 (!%p326_p13), %s2360_s10, 3  ;;  %s2470_s26 = scalar_lea.vmem (!%p326_p13), %s2358_s29, %s454_s22 }
  0x69   : > { %s2473_s30 = scalar_lea.vmem (!%p326_p13), %s2362_s15, %s454_s22 [#allocation3]  ;;  %1926 = sdivrem.u32 (!%p326_p13), %s458_s23, 12 }
  0x72   : > { %s2477_s24 = spop.drf %1926 }
  0x73   : > { %s1928_s0 = spop.drf %1926  ;;  %p1640_p10 = scmp.le.s32.totalorder %s2477_s24, 0 }
  0x74   : > { %s2943_s13 = smov (!%p1640_p10), %s2362_s15  ;;  %s2944_s8 = smov (!%p1640_p10), %s2358_s29 }
  0x75   : > { %1581 = sbr.rel (%p1640_p10) target bundleno = 139 (0x8b), region = 196  ;;  %s2486_s25 = smov (!%p1640_p10), 0  }
  0x76   : > { %s2488_s27 = smov (!%p1640_p10), 0  }
  0x7a LB: >> { %v482_v20 = vld [vmem:[%s2220_s8 + $0x30] sm:$0xff]  ;;  %v484_v21 = vld [vmem:[%s2220_s8 + $0x38] sm:$0xff]  ;;  %s542_s28 = sadd.s32 1, %s2224_s25  ;;  %v470_v23 = vld [vmem:[%s2220_s8] sm:$0xff]  ;;  %s464_s27 = sadd.s32 1, %s2228_s27   ;;  %s2228_s27 = sphi %s2488_s27, %s464_s27   ;;  %s2224_s25 = sphi %s2486_s25, %s2947_s25   ;;  %s2220_s8 = sphi %s2944_s8, %s2946_s8   ;;  %s2216_s13 = sphi %s2943_s13, %s2945_s13  }
  0x7b   : >> { %519 = vst [vmem:[%s2216_s13 + $0x20] sm:$0xff] %v482_v20  ;;  %v476_v22 = vld [vmem:[%s2220_s8 + $0x18] sm:$0xff]  ;;  %v472_v24 = vld [vmem:[%s2220_s8 + $0x8] sm:$0xff]  ;;  %p543_p11 = scmp.ge.s32.totalorder %s542_s28, %s2477_s24  ;;  %v486_v25 = vld [vmem:[%s2220_s8 + $0x40] sm:$0xff]  ;;  %p463_p12 = scmp.ge.s32.totalorder %s464_s27, %s2477_s24 }
  0x7c   : >> { %521 = vst [vmem:[%s2216_s13 + $0x28] sm:$0xff] %v484_v21  ;;  %v496_v26 = vld [vmem:[%s2220_s8 + $0x20] sm:$0xff]  ;;  %v488_v27 = vld [vmem:[%s2220_s8 + $0x48] sm:$0xff]  ;;  %v490_v28 = vld [vmem:[%s2220_s8 + $0x50] sm:$0xff] }
  0x7d   : >> { %495 = vst [vmem:[%s2216_s13 + $0x10] sm:$0xff] %v476_v22  ;;  %s2963_s28 = smov (%p543_p11, %s542_s28), 0  ;;  %v492_v29 = vld [vmem:[%s2220_s8 + $0x58] sm:$0xff]  ;;  %v512_v30 = vld [vmem:[%s2220_s8 + $0x60] sm:$0xff]  ;;  %v514_v31 = vld [vmem:[%s2220_s8 + $0x68] sm:$0xff] }
  0x7e   : >> { %471 = vst [vmem:[%s2216_s13] sm:$0xff] %v470_v23  ;;  %s545_s19 = smul.u32 96, %s2963_s28  ;;  %v516_v32 = vld [vmem:[%s2220_s8 + $0x70] sm:$0xff]  ;;  %v536_v33 = vld [vmem:[%s2220_s8 + $0x78] sm:$0xff]  ;;  %v538_v34 = vld [vmem:[%s2220_s8 + $0x80] sm:$0xff]  ;;  %s2947_s25 = smov %s2963_s28 }
  0x7f   : >> { %473 = vst [vmem:[%s2216_s13 + $0x8] sm:$0xff] %v472_v24  ;;  %v540_v35 = vld [vmem:[%s2220_s8 + $0x88] sm:$0xff] }
  0x80   : >> { %497 = vst [vmem:[%s2216_s13 + $0x18] sm:$0xff] %v496_v26  ;;  %s547_s18 = scalar_lea.vmem %s2358_s29, %s545_s19   ;;  %s548_s22 = scalar_lea.vmem %s2362_s15, %s545_s19 [#allocation3]  }
  0x81   : >> { %523 = vst [vmem:[%s2216_s13 + $0x30] sm:$0xff] %v486_v25  ;;  %s2946_s8 = smov %s547_s18 }
  0x82   : >> { %525 = vst [vmem:[%s2216_s13 + $0x38] sm:$0xff] %v488_v27 }
  0x83   : >> { %527 = vst [vmem:[%s2216_s13 + $0x40] sm:$0xff] %v490_v28 }
  0x84   : >> { %529 = vst [vmem:[%s2216_s13 + $0x48] sm:$0xff] %v492_v29 }
  0x85   : >> { %531 = vst [vmem:[%s2216_s13 + $0x50] sm:$0xff] %v512_v30 }
  0x86   : >> { %533 = vst [vmem:[%s2216_s13 + $0x58] sm:$0xff] %v514_v31  ;;  %466 = sbr.rel (!%p463_p12) target bundleno = 122 (0x7a), region = 202 }
  0x87   : >> { %535 = vst [vmem:[%s2216_s13 + $0x60] sm:$0xff] %v516_v32 }
  0x88   : >> { %537 = vst [vmem:[%s2216_s13 + $0x68] sm:$0xff] %v536_v33 }
  0x89   : >> { %539 = vst [vmem:[%s2216_s13 + $0x70] sm:$0xff] %v538_v34 }
  0x8a   : >> { %541 = vst [vmem:[%s2216_s13 + $0x78] sm:$0xff] %v540_v35  ;;  %s2945_s13 = smov %s548_s22 }
  0x8b PF: > { %1929 = sdivrem.u32 %s458_s23, 12 }
  0x8c   : > { %s1641_s0 = smul.u32 96, %s2477_s24 }
  0x8e   : > { %s2549_s19 = scalar_lea.vmem %s2358_s29, %s1641_s0   ;;  %s2552_s16 = scalar_lea.vmem %s2362_s15, %s1641_s0 [#allocation3]  }
  0x94   : > { %s1930_s22 = spop.drf %1929 }
  0x95   : > { %s2554_s21 = spop.drf %1929 }
  0x96   : > { %p1643_p13 = scmp.le.s32.totalorder %s2554_s21, 0 }
  0x97   : > { %s2948_s13 = smov (!%p1643_p13), %s2552_s16  ;;  %s2234_s8 = smov (!%p1643_p13), %s2549_s19  }
  0x98   : > { %1595 = sbr.rel (%p1643_p13) target bundleno = 165 (0xa5), region = 207  ;;  %s2238_s25 = smov (!%p1643_p13), 0  }
  0x99   : > { %s2242_s27 = smov (!%p1643_p13), 0  }
  0x9d LB: >> { %v565_v36 = vld [vmem:[%s2236_s8] sm:$0xff]  ;;  %v567_v37 = vld [vmem:[%s2236_s8 + $0x18] sm:$0xff]  ;;  %v569_v38 = vld [vmem:[%s2236_s8 + $0x30] sm:$0xff]  ;;  %s571_s23 = sadd.s32 1, %s2240_s25  ;;  %s559_s27 = sadd.s32 1, %s2244_s27   ;;  %s2244_s27 = sphi %s2242_s27, %s559_s27   ;;  %s2240_s25 = sphi %s2238_s25, %s2239_s25   ;;  %s2236_s8 = sphi %s2234_s8, %s576_s8   ;;  %s2232_s13 = sphi %s2948_s13, %s577_s13  }
  0x9e   : >> { %566 = vst [vmem:[%s2232_s13] sm:$0xff] %v565_v36  ;;  %p572_p0 = scmp.ge.s32.totalorder %s571_s23, %s2554_s21  ;;  %p558_p1 = scmp.ge.s32.totalorder %s559_s27, %s2554_s21 }
  0x9f   : >> { %568 = vst [vmem:[%s2232_s13 + $0x10] sm:$0xff] %v567_v37 }
  0xa0   : >> { %570 = vst [vmem:[%s2232_s13 + $0x20] sm:$0xff] %v569_v38  ;;  %s2965_s23 = smov (%p572_p0, %s571_s23), 0  ;;  %561 = sbr.rel (!%p558_p1) target bundleno = 157 (0x9d), region = 213 }
  0xa1   : >> { %s1644_s24 = sshll.u32 %s2965_s23, 3  ;;  %s2239_s25 = smov %s2965_s23  }
  0xa2   : >> { %s576_s8 = scalar_lea.vmem %s2549_s19, %s1644_s24   ;;  %s577_s13 = scalar_lea.vmem %s2552_s16, %s1644_s24 [#allocation3]  }
  0xa5 PF: > { %s2246_s28 = smov 1  }
  0xa6   : > { %s578_s18 = sshll.u32 %s2246_s28, %s2366_s17 }
  0xa7   : > { %s1646_s0 = sadd.s32 4294967295, %s578_s18 }
  0xa8   : > { %v588_v39 = vld [vmem:[%s2470_s26] sm:%s1646_s0]  ;;  %v590_v40 = vld [vmem:[%s2470_s26 + $0x18] sm:%s1646_s0] }
  0xa9   : > { %589 = vst [vmem:[%s2473_s30] sm:%s1646_s0] %v588_v39  ;;  %v592_v41 = vld [vmem:[%s2470_s26 + $0x30] sm:%s1646_s0] }
  0xaa   : > { %591 = vst [vmem:[%s2473_s30 + $0x10] sm:%s1646_s0] %v590_v40 }
  0xab   : > { %593 = vst [vmem:[%s2473_s30 + $0x20] sm:%s1646_s0] %v592_v41 }
  0xac PF: > { %p1647_p2 = scmp.ge.u32.totalorder %s2360_s10, 8 }
  0xad   : > { %s2247_s16 = smov (!%p1647_p2), 1  }
  0xae   : > { %308 = sbr.rel (%p1647_p2) target bundleno = 183 (0xb7), region = 64  ;;  %s309_s21 = sshll.u32 (!%p1647_p2), %s2247_s16, %s2360_s10 }
  0xaf   : > { %s1648_s17 = sadd.s32 (!%p1647_p2), 4294967295, %s309_s21 }
  0xb3   : > { %v319_v42 = vld [vmem:[%s2358_s29] sm:%s1648_s17]  ;;  %v321_v43 = vld [vmem:[%s2358_s29 + $0x18] sm:%s1648_s17] }
  0xb4   : > { %320 = vst [vmem:[%s2362_s15] sm:%s1648_s17] %v319_v42  ;;  %v323_v44 = vld [vmem:[%s2358_s29 + $0x30] sm:%s1648_s17] }
  0xb5   : > { %322 = vst [vmem:[%s2362_s15 + $0x10] sm:%s1648_s17] %v321_v43 }
  0xb6   : > { %324 = vst [vmem:[%s2362_s15 + $0x20] sm:%s1648_s17] %v323_v44 }
  0xb7 PF: > { %p1649_p3 = scmp.ge.s32.totalorder %s2180_s14, 1  ;;  %p596_p4 = scmp.lt.s32.totalorder %s2180_s14, 3 }
  0xb9   : > { %p597_p5 = pnand %p1649_p3, %p596_p4 }
  0xba   : > { %s2589_s10 = sand.u32 (!%p597_p5), 1, %s2172_s12  }
  0xbb   : > { %600 = sbr.rel (%p597_p5) target bundleno = 1053 (0x41d), region = 118  ;;  %s1650_s28 = sshll.u32 (!%p597_p5), %s2589_s10, 1 }
  0xbc   : > { %s1748_s15 = smul.u32 (!%p597_p5), 48, %s2589_s10  ;;  %s637_s18 = scalar_lea.vmem (!%p597_p5), [#allocation4], %s1650_s28 }
  0xbd   : > { %s1454_s0 = scalar_lea.sflag (!%p597_p5), [#allocation5], %s2589_s10 }
  0xbe   : > { %s605_s8 = scalar_lea.vmem (!%p597_p5), [#allocation3], %s1748_s15 }
  0xc0   : > { %v671_v45 = vld [vmem:[%s2916_s2 + $0x30] sm:$0x3]  ;;  %v670_v46 = vld [vmem:[%s2916_s2 + $0x28] sm:$0xff]  ;;  %v2248_v47 = vmov 0   ;;  %v668_v48 = vld [vmem:[%s2916_s2 + $0x18] sm:$0xff]  ;;  %vm738_vm0 = vcmask 1040384  }
  0xc1   : > { %1932 = vset.pattern.permute.xlu0 %v2248_v47  ;;  %1933 = vset.pattern.permute.xlu1 %v2248_v47  ;;  %v652_v49 = vld [vmem:[%s605_s8 + $0x20] sm:$0x3]  ;;  %v653_v50 = vld [vmem:[%s605_s8 + $0x28] sm:$0x3]  ;;  %v650_v54 = vld [vmem:[%s605_s8 + $0x10] sm:$0xff]  ;;  %vm725_vm1 = vcmask 146432  }
  0xc2   : > { %704 = vperm.xlu0 %1932, %v671_v45   ;;  %699 = vperm.xlu1 %1933, %v670_v46   ;;  %v648_v51 = vld [vmem:[%s605_s8] sm:$0xff]  ;;  %v656_v52 = vpack.c.bf16 %v652_v49, %v652_v49  ;;  %v657_v53 = vpack.c.bf16 %v653_v50, %v653_v50  ;;  %v649_v55 = vld [vmem:[%s605_s8 + $0x8] sm:$0xff]  ;;  %v651_v56 = vld [vmem:[%s605_s8 + $0x18] sm:$0xff]  ;;  %vm1008_vm2 = vcmask 408576   ;;  %vm1316_vm3 = vcmask 1043456   ;;  %s2949_s16 = sadd.s32 (%p2341_p6), 4294967295, %s2180_s14  }
  0xc3   : > { %1934 = vset.pattern.permute.xlu2 %v2248_v47  ;;  %v669_v59 = vld [vmem:[%s2916_s2 + $0x20] sm:$0xff]  ;;  %v667_v60 = vld [vmem:[%s2916_s2 + $0x10] sm:$0xff]  ;;  %v654_v61 = vpack.c.bf16 %v650_v54, %v648_v51  ;;  %v655_v62 = vpack.c.bf16 %v651_v56, %v649_v55  ;;  %v666_v1 = vld [vmem:[%s2916_s2 + $0x8] sm:$0xff]  ;;  %vm1309_vm4 = vcmask 982016   ;;  %vm1405_vm5 = vcmask 261120   ;;  %s1730_s21 = sshll.u32 (%p2341_p6), %s2949_s16, 1 }
  0xc4   : > { %689 = vperm.xlu2 %1934, %v668_v48   ;;  %v740_v57 = vsel %vm738_vm0, %v656_v52, 0  ;;  %v743_v58 = vsel %vm738_vm0, %v657_v53, 0  ;;  %v665_v63 = vld [vmem:[%s2916_s2] sm:$0xff]  ;;  %v894_v2 = vld [vmem:[%s2918_s4 + $0x70] sm:$0xff]  ;;  %v893_v4 = vld [vmem:[%s2918_s4 + $0x68] sm:$0xff]  ;;  %s1462_s17 = ssub.s32 (%p2341_p6), 3, %s1730_s21 }
  0xc5   : > { %751 = vmatpush.bf16.msra.mxu0 %v740_v57  ;;  %779 = vmatpush.bf16.msra.mxu1 %v743_v58  ;;  %v1735_v0 = vld [vmem:[%s2915_s1] sm:$0xff]  ;;  %v890_v5 = vld [vmem:[%s2918_s4 + $0x50] sm:$0xff]  ;;  %v891_v6 = vld [vmem:[%s2918_s4 + $0x58] sm:$0xff]  ;;  %p1463_p7 = scmp.lt.s32.totalorder (%p2341_p6), %s1462_s17, 2 }
  0xc6   : > { %v892_v3 = vld [vmem:[%s2918_s4 + $0x60] sm:$0xff]  ;;  %v1736_v7 = vld [vmem:[%s2915_s1 + $0x8] sm:$0xff]  ;;  %v886_v10 = vld [vmem:[%s2918_s4 + $0x30] sm:$0xff] }
  0xc7   : > { %v888_v8 = vld [vmem:[%s2918_s4 + $0x40] sm:$0xff]  ;;  %v889_v9 = vld [vmem:[%s2918_s4 + $0x48] sm:$0xff]  ;;  %v887_v11 = vld [vmem:[%s2918_s4 + $0x38] sm:$0xff] }
  0xc8   : > { %v884_v12 = vld [vmem:[%s2918_s4 + $0x20] sm:$0xff]  ;;  %v885_v13 = vld [vmem:[%s2918_s4 + $0x28] sm:$0xff]  ;;  %v1737_v14 = vld [vmem:[%s2915_s1 + $0x10] sm:$0xff] }
  0xc9   : > { %752 = vmatpush.bf16.msra.mxu0 %v654_v61  ;;  %780 = vmatpush.bf16.msra.mxu1 %v655_v62  ;;  %v882_v15 = vld [vmem:[%s2918_s4 + $0x10] sm:$0xff]  ;;  %v883_v16 = vld [vmem:[%s2918_s4 + $0x18] sm:$0xff]  ;;  %v880_v17 = vld [vmem:[%s2918_s4] sm:$0xff] }
  0xca   : > { %694 = vperm.xlu0 %1932, %v669_v59   ;;  %684 = vperm.xlu1 %1933, %v667_v60   ;;  %v664_v18 = vld [vmem:[%s2915_s1 + $0x18] sm:$0x1]  ;;  %v881_v19 = vld [vmem:[%s2918_s4 + $0x8] sm:$0xff]  ;;  %v1277_v21 = vld [vmem:[%s2920_s6 + $0x10] sm:$0xff] }
  0xcb   : > { %v720_v20 = vunpack.c.l.b16 %v664_v18  ;;  %v1278_v22 = vld [vmem:[%s2920_s6 + $0x18] sm:$0xff]  ;;  %v1275_v24 = vld [vmem:[%s2920_s6] sm:$0xff]  ;;  %v1276_v25 = vld [vmem:[%s2920_s6 + $0x8] sm:$0xff] }
  0xcc   : > { %674 = vperm.xlu2 %1934, %v665_v63   ;;  %1663 = vmatmul.msk.bf16.vlgmr.msra.gmra.mxu0 %vm725_vm1, %v1735_v0  ;;  %v1398_v26 = vld [vmem:[#allocation2] sm:$0x1] }
  0xcd   : > { %1667 = vmatmul.msk.bf16.vlgmr.msra.gmra.mxu1 %vm725_vm1, %v1735_v0  ;;  %v724_v23 = vpack.c.b16 %v720_v20, %v720_v20 }
  0xd2   : > { %679 = vperm.xlu0 %1932, %v666_v1   ;;  %967 = vperm.xlu1 %1933, %v894_v2  }
  0xd4   : > { %957 = vperm.xlu2 %1934, %v892_v3  }
  0xda   : > { %962 = vperm.xlu0 %1932, %v893_v4   ;;  %947 = vperm.xlu1 %1933, %v890_v5  }
  0xdc   : > { %952 = vperm.xlu2 %1934, %v891_v6   ;;  %1664 = vmatmul.msk.bf16.gmra.mxu0 %vm725_vm1, %v1736_v7 }
  0xdd   : > { %1668 = vmatmul.msk.bf16.gmra.mxu1 %vm725_vm1, %v1736_v7 }
  0xe2   : > { %937 = vperm.xlu0 %1932, %v888_v8   ;;  %942 = vperm.xlu1 %1933, %v889_v9  }
  0xe4   : > { %927 = vperm.xlu2 %1934, %v886_v10  }
  0xea   : > { %932 = vperm.xlu0 %1932, %v887_v11   ;;  %917 = vperm.xlu1 %1933, %v884_v12  }
  0xec   : > { %922 = vperm.xlu2 %1934, %v885_v13   ;;  %1665 = vmatmul.msk.bf16.gmra.mxu0 %vm725_vm1, %v1737_v14 }
  0xed   : > { %1669 = vmatmul.msk.bf16.gmra.mxu1 %vm725_vm1, %v1737_v14 }
  0xf2   : > { %907 = vperm.xlu0 %1932, %v882_v15   ;;  %912 = vperm.xlu1 %1933, %v883_v16  }
  0xf4   : > { %897 = vperm.xlu2 %1934, %v880_v17  }
  0xfa   : > { %902 = vperm.xlu0 %1932, %v881_v19   ;;  %1291 = vperm.xlu1 %1933, %v1277_v21  }
  0xfc   : > { %1296 = vperm.xlu2 %1934, %v1278_v22   ;;  %1666 = vmatmul.msk.bf16.gmra.mxu0 %vm725_vm1, %v724_v23 }
  0xfd   : > { %1670 = vmatmul.msk.bf16.gmra.mxu1 %vm725_vm1, %v724_v23 }
 0x102   : > { %1281 = vperm.xlu0 %1932, %v1275_v24   ;;  %1286 = vperm.xlu1 %1933, %v1276_v25  }
 0x104   : > { %1401 = vperm.xlu2 %1934, %v1398_v26  }
 0x11e   : > { %v690_v43 = vpop.permute.xlu2 %689 }
 0x126   : > { %v675_v1 = vpop.permute.xlu2 %674 }
 0x134   : > { %v705_v35 = vpop.permute.xlu0 %704  ;;  %v700_v38 = vpop.permute.xlu1 %699 }
 0x13c   : > { %v695_v41 = vpop.permute.xlu0 %694  ;;  %v685_v53 = vpop.permute.xlu1 %684 }
 0x144   : > { %v680_v59 = vpop.permute.xlu0 %679 }
 0x149   : > { %v754_v27 = vpop.f32.mrf.mxu0 }
 0x14a   : > { %v782_v28 = vpop.f32.mrf.mxu1  ;;  %v755_v4 = vadd.f32 %v754_v27, %v675_v1 }
 0x14b   : > { %v783_v6 = vadd.f32 %v782_v28, %v675_v1 }
 0x14c   : > { %v801_v15 = vmul.f32 0.5, %v755_v4  ;;  %v1740_v4 = vld [vmem:[%s2917_s3 + $0x10] sm:$0xff] }
 0x14d   : > { %v802_v17 = vmul.f32 0.5, %v783_v6  ;;  %v1742_v6 = vld [vmem:[%s2917_s3 + $0x20] sm:$0xff] }
 0x151   : > { %v756_v29 = vpop.f32.mrf.mxu0 }
 0x152   : > { %v784_v30 = vpop.f32.mrf.mxu1  ;;  %v757_v63 = vadd.f32 %v756_v29, %v680_v59 }
 0x153   : > { %v785_v2 = vadd.f32 %v784_v30, %v680_v59 }
 0x154   : > { %v803_v9 = vmul.f32 0.5, %v757_v63 }
 0x155   : > { %v804_v13 = vmul.f32 0.5, %v785_v2  ;;  %v1738_v2 = vld [vmem:[%s2917_s3] sm:$0xff] }
 0x159   : > { %v759_v31 = vpop.f32.mrf.mxu0 }
 0x15a   : > { %v787_v32 = vpop.f32.mrf.mxu1  ;;  %v760_v57 = vadd.f32 %v759_v31, %v685_v53 }
 0x15b   : > { %v788_v58 = vadd.f32 %v787_v32, %v685_v53 }
 0x15c   : > { %v805_v5 = vmul.f32 0.5, %v760_v57 }
 0x15d   : > { %v806_v7 = vmul.f32 0.5, %v788_v58 }
 0x161   : > { %v761_v33 = vpop.f32.mrf.mxu0 }
 0x162   : > { %v789_v34 = vpop.f32.mrf.mxu1  ;;  %v762_v49 = vadd.f32 %v761_v33, %v690_v43 }
 0x163   : > { %v790_v54 = vadd.f32 %v789_v34, %v690_v43 }
 0x164   : > { %v807_v0 = vmul.f32 0.5, %v762_v49 }
 0x165   : > { %v808_v3 = vmul.f32 0.5, %v790_v54 }
 0x169   : > { %v764_v36 = vpop.f32.mrf.mxu0 }
 0x16a   : > { %v792_v37 = vpop.f32.mrf.mxu1  ;;  %v765_v42 = vadd.f32 %v764_v36, %v695_v41 }
 0x16b   : > { %v793_v47 = vadd.f32 %v792_v37, %v695_v41 }
 0x16c   : > { %v809_v46 = vmul.f32 0.5, %v765_v42 }
 0x16d   : > { %v810_v60 = vmul.f32 0.5, %v793_v47 }
 0x16e   : > { %1935 = vtanh.f32 %v809_v46 }
 0x171   : > { %v766_v39 = vpop.f32.mrf.mxu0 }
 0x172   : > { %v794_v40 = vpop.f32.mrf.mxu1  ;;  %v767_v44 = vadd.f32 %v766_v39, %v700_v38 }
 0x173   : > { %v795_v45 = vadd.f32 %v794_v40, %v700_v38 }
 0x174   : > { %v811_v48 = vmul.f32 0.5, %v767_v44  ;;  %v1936_v8 = vpop.eup %1935 }
 0x175   : > { %v812_v50 = vmul.f32 0.5, %v795_v45  ;;  %v837_v27 = vmul.f32 0.5, %v1936_v8  ;;  %v2721_v8 = vpop.permute.xlu2 %957 }
 0x176   : > { %1937 = vtanh.f32 %v811_v48 }
 0x177   : > { %1939 = vtanh.f32 %v812_v50  ;;  %v851_v43 = vadd.f32 0.5, %v837_v27 }
 0x179   : > { %v769_v51 = vpop.f32.mrf.mxu0 }
 0x17a   : > { %v797_v52 = vpop.f32.mrf.mxu1  ;;  %v770_v55 = vadd.f32 %v769_v51, %v705_v35 }
 0x17b   : > { %v798_v56 = vadd.f32 %v797_v52, %v705_v35 }
 0x17c   : > { %v813_v61 = vmul.f32 0.5, %v770_v55  ;;  %v1938_v12 = vpop.eup %1937 }
 0x17d   : > { %v814_v62 = vmul.f32 0.5, %v798_v56  ;;  %v1940_v14 = vpop.eup %1939  ;;  %v839_v21 = vmul.f32 0.5, %v1938_v12  ;;  %v871_v12 = vld [vmem:[%s2917_s3 + $0x38] sm:$0xf] }
 0x17e   : > { %1941 = vtanh.f32 %v813_v61  ;;  %v840_v24 = vmul.f32 0.5, %v1940_v14 }
 0x17f   : > { %1943 = vtanh.f32 %v814_v62  ;;  %v853_v35 = vadd.f32 0.5, %v839_v21 }
 0x180   : > { %1945 = vtanh.f32 %v810_v60  ;;  %v854_v39 = vadd.f32 0.5, %v840_v24 }
 0x181   : > { %1947 = vtanh.f32 %v807_v0  ;;  %v771_v10 = vpop.f32.mrf.mxu0  ;;  %v876_v49 = vpack.c.bf16 %v853_v35, %v851_v43 }
 0x182   : > { %v799_v11 = vpop.f32.mrf.mxu1  ;;  %1949 = vtanh.f32 %v808_v3  ;;  %v1739_v3 = vld [vmem:[%s2917_s3 + $0x8] sm:$0xff]  ;;  %v2728_v10 = vpop.permute.xlu0 %962 }
 0x183   : > { %1951 = vtanh.f32 %v805_v5  ;;  %v1741_v5 = vld [vmem:[%s2917_s3 + $0x18] sm:$0xff]  ;;  %v2730_v11 = vpop.permute.xlu2 %952 }
 0x184   : > { %v1942_v16 = vpop.eup %1941  ;;  %1953 = vtanh.f32 %v806_v7  ;;  %v1743_v7 = vld [vmem:[%s2917_s3 + $0x28] sm:$0xff] }
 0x185   : > { %v1944_v18 = vpop.eup %1943  ;;  %1955 = vtanh.f32 %v803_v9  ;;  %v841_v19 = vmul.f32 0.5, %v1942_v16  ;;  %v1744_v9 = vld [vmem:[%s2917_s3 + $0x30] sm:$0xff] }
 0x186   : > { %v1946_v20 = vpop.eup %1945  ;;  %1957 = vtanh.f32 %v804_v13  ;;  %v842_v22 = vmul.f32 0.5, %v1944_v18  ;;  %v999_v13 = vunpack.c.l.b16 %v871_v12 }
 0x187   : > { %v1948_v23 = vpop.eup %1947  ;;  %1959 = vtanh.f32 %v801_v15  ;;  %v855_v25 = vadd.f32 0.5, %v841_v19  ;;  %v838_v30 = vmul.f32 0.5, %v1946_v20 }
 0x188   : > { %v1950_v26 = vpop.eup %1949  ;;  %1961 = vtanh.f32 %v802_v17  ;;  %v856_v28 = vadd.f32 0.5, %v842_v22  ;;  %v835_v33 = vmul.f32 0.5, %v1948_v23  ;;  %v1007_v14 = vpack.c.b16 %v999_v13, %v999_v13  ;;  %v2741_v17 = vpop.permute.xlu1 %967 }
 0x189   : > { %v1952_v29 = vpop.eup %1951  ;;  %v878_v31 = vpack.c.bf16 %v855_v25, %v855_v25  ;;  %v836_v37 = vmul.f32 0.5, %v1950_v26  ;;  %v852_v46 = vadd.f32 0.5, %v838_v30 }
 0x18a   : > { %v1954_v32 = vpop.eup %1953  ;;  %v879_v34 = vpack.c.bf16 %v856_v28, %v856_v28  ;;  %v833_v41 = vmul.f32 0.5, %v1952_v29  ;;  %v849_v50 = vadd.f32 0.5, %v835_v33  ;;  %v2735_v15 = vpop.permute.xlu0 %937 }
 0x18b   : > { %v1956_v36 = vpop.eup %1955  ;;  %v1034_v38 = vsel %vm738_vm0, %v878_v31, 0  ;;  %v834_v45 = vmul.f32 0.5, %v1954_v32  ;;  %v877_v52 = vpack.c.bf16 %v854_v39, %v852_v46  ;;  %v850_v53 = vadd.f32 0.5, %v836_v37  ;;  %v2737_v16 = vpop.permute.xlu2 %927 }
 0x18c   : > { %v1958_v40 = vpop.eup %1957  ;;  %1043 = vmatpush.bf16.msra.mxu2 %v1034_v38  ;;  %v1037_v42 = vsel %vm738_vm0, %v879_v34, 0  ;;  %v831_v48 = vmul.f32 0.5, %v1956_v36  ;;  %v847_v55 = vadd.f32 0.5, %v833_v41 }
 0x18d   : > { %v1960_v44 = vpop.eup %1959  ;;  %1091 = vmatpush.bf16.msra.mxu3 %v1037_v42  ;;  %v832_v51 = vmul.f32 0.5, %v1958_v40  ;;  %v848_v57 = vadd.f32 0.5, %v834_v45 }
 0x18e   : > { %v1962_v47 = vpop.eup %1961  ;;  %v829_v54 = vmul.f32 0.5, %v1960_v44  ;;  %v874_v58 = vpack.c.bf16 %v849_v50, %v847_v55  ;;  %v845_v59 = vadd.f32 0.5, %v831_v48 }
 0x18f   : > { %v830_v56 = vmul.f32 0.5, %v1962_v47  ;;  %v875_v60 = vpack.c.bf16 %v850_v53, %v848_v57  ;;  %v846_v61 = vadd.f32 0.5, %v832_v51 }
 0x190   : > { %1044 = vmatpush.bf16.msra.mxu2 %v876_v49  ;;  %v843_v62 = vadd.f32 0.5, %v829_v54  ;;  %v2747_v20 = vpop.permute.xlu1 %947 }
 0x191   : > { %1092 = vmatpush.bf16.msra.mxu3 %v877_v52  ;;  %v844_v63 = vadd.f32 0.5, %v830_v56 }
 0x192   : > { %v872_v0 = vpack.c.bf16 %v845_v59, %v843_v62  ;;  %v2743_v18 = vpop.permute.xlu0 %932 }
 0x193   : > { %v873_v1 = vpack.c.bf16 %v846_v61, %v844_v63  ;;  %v2745_v19 = vpop.permute.xlu2 %922 }
 0x194   : > { %1045 = vmatpush.bf16.msra.mxu2 %v874_v58 }
 0x195   : > { %1093 = vmatpush.bf16.msra.mxu3 %v875_v60 }
 0x198   : > { %1046 = vmatpush.bf16.msra.mxu2 %v872_v0  ;;  %v2749_v27 = vpop.permute.xlu1 %942 }
 0x199   : > { %1094 = vmatpush.bf16.msra.mxu3 %v873_v1 }
 0x19a   : > { %v908_v21 = vpop.permute.xlu0 %907 }
 0x19b   : > { %1699 = vmatmul.msk.bf16.vlgmr.msra.gmra.mxu2 %vm1008_vm2, %v1738_v2  ;;  %v898_v22 = vpop.permute.xlu2 %897 }
 0x19c   : > { %1707 = vmatmul.msk.bf16.vlgmr.msra.gmra.mxu3 %vm1008_vm2, %v1738_v2 }
 0x1a0   : > { %v918_v37 = vpop.permute.xlu1 %917 }
 0x1a2   : > { %v903_v30 = vpop.permute.xlu0 %902 }
 0x1a8   : > { %v913_v56 = vpop.permute.xlu1 %912 }
 0x1ab   : > { %1700 = vmatmul.msk.bf16.gmra.mxu2 %vm1008_vm2, %v1739_v3 }
 0x1ac   : > { %1708 = vmatmul.msk.bf16.gmra.mxu3 %vm1008_vm2, %v1739_v3 }
 0x1bb   : > { %1701 = vmatmul.msk.bf16.gmra.mxu2 %vm1008_vm2, %v1740_v4 }
 0x1bc   : > { %1709 = vmatmul.msk.bf16.gmra.mxu3 %vm1008_vm2, %v1740_v4 }
 0x1cb   : > { %1702 = vmatmul.msk.bf16.gmra.mxu2 %vm1008_vm2, %v1741_v5 }
 0x1cc   : > { %1710 = vmatmul.msk.bf16.gmra.mxu3 %vm1008_vm2, %v1741_v5 }
 0x1db   : > { %1703 = vmatmul.msk.bf16.gmra.mxu2 %vm1008_vm2, %v1742_v6 }
 0x1dc   : > { %1711 = vmatmul.msk.bf16.gmra.mxu3 %vm1008_vm2, %v1742_v6 }
 0x1eb   : > { %1704 = vmatmul.msk.bf16.gmra.mxu2 %vm1008_vm2, %v1743_v7 }
 0x1ec   : > { %1712 = vmatmul.msk.bf16.gmra.mxu3 %vm1008_vm2, %v1743_v7 }
 0x1fb   : > { %1705 = vmatmul.msk.bf16.gmra.mxu2 %vm1008_vm2, %v1744_v9 }
 0x1fc   : > { %1713 = vmatmul.msk.bf16.gmra.mxu3 %vm1008_vm2, %v1744_v9 }
 0x20b   : > { %1706 = vmatmul.msk.bf16.gmra.mxu2 %vm1008_vm2, %v1007_v14 }
 0x20c   : > { %1714 = vmatmul.msk.bf16.gmra.mxu3 %vm1008_vm2, %v1007_v14 }
 0x21e   : > { %v1048_v23 = vpop.f32.mrf.mxu2 }
 0x21f   : > { %v1049_v24 = vadd.f32 %v1048_v23, %v898_v22  ;;  %v1096_v25 = vpop.f32.mrf.mxu3 }
 0x220   : > { %v1097_v26 = vadd.f32 %v1096_v25, %v898_v22 }
 0x221   : > { %v1135_v28 = vmul.f32 0.5, %v1049_v24 }
 0x222   : > { %v1136_v29 = vmul.f32 0.5, %v1097_v26 }
 0x223   : > { %1963 = vtanh.f32 %v1135_v28 }
 0x224   : > { %1965 = vtanh.f32 %v1136_v29 }
 0x226   : > { %v1050_v31 = vpop.f32.mrf.mxu2 }
 0x227   : > { %v1051_v32 = vadd.f32 %v1050_v31, %v903_v30  ;;  %v1098_v33 = vpop.f32.mrf.mxu3 }
 0x228   : > { %v1099_v34 = vadd.f32 %v1098_v33, %v903_v30 }
 0x229   : > { %v1137_v35 = vmul.f32 0.5, %v1051_v32  ;;  %v1964_v38 = vpop.eup %1963 }
 0x22a   : > { %v1138_v36 = vmul.f32 0.5, %v1099_v34  ;;  %v1966_v39 = vpop.eup %1965  ;;  %v1195_v43 = vmul.f32 0.5, %v1964_v38 }
 0x22b   : > { %1967 = vtanh.f32 %v1137_v35  ;;  %v1196_v46 = vmul.f32 0.5, %v1966_v39 }
 0x22c   : > { %1969 = vtanh.f32 %v1138_v36  ;;  %v2751_v52 = vadd.f32 0.5, %v1195_v43 }
 0x22d   : > { %v2755_v54 = vadd.f32 0.5, %v1196_v46 }
 0x22e   : > { %v1053_v40 = vpop.f32.mrf.mxu2 }
 0x22f   : > { %v1054_v41 = vadd.f32 %v1053_v40, %v908_v21  ;;  %v1101_v42 = vpop.f32.mrf.mxu3 }
 0x230   : > { %v1102_v44 = vadd.f32 %v1101_v42, %v908_v21 }
 0x231   : > { %v1968_v45 = vpop.eup %1967  ;;  %v1139_v50 = vmul.f32 0.5, %v1054_v41 }
 0x232   : > { %v1970_v47 = vpop.eup %1969  ;;  %v1197_v48 = vmul.f32 0.5, %v1968_v45  ;;  %v1140_v51 = vmul.f32 0.5, %v1102_v44 }
 0x233   : > { %v1198_v49 = vmul.f32 0.5, %v1970_v47  ;;  %1971 = vtanh.f32 %v1139_v50 }
 0x234   : > { %v2753_v53 = vadd.f32 0.5, %v1197_v48  ;;  %1973 = vtanh.f32 %v1140_v51 }
 0x235   : > { %v2757_v55 = vadd.f32 0.5, %v1198_v49 }
 0x236   : > { %v1055_v57 = vpop.f32.mrf.mxu2  ;;  %v1259_v58 = vpack.c.bf16 %v2753_v53, %v2751_v52  ;;  %v1282_v52 = vpop.permute.xlu0 %1281 }
 0x237   : > { %v1056_v59 = vadd.f32 %v1055_v57, %v913_v56  ;;  %v1103_v60 = vpop.f32.mrf.mxu3  ;;  %v1260_v61 = vpack.c.bf16 %v2757_v55, %v2755_v54 }
 0x238   : > { %v1104_v62 = vadd.f32 %v1103_v60, %v913_v56 }
 0x239   : > { %v1141_v63 = vmul.f32 0.5, %v1056_v59  ;;  %v1972_v1 = vpop.eup %1971 }
 0x23a   : > { %v1142_v0 = vmul.f32 0.5, %v1104_v62  ;;  %v1974_v2 = vpop.eup %1973  ;;  %v1199_v6 = vmul.f32 0.5, %v1972_v1 }
 0x23b   : > { %1975 = vtanh.f32 %v1141_v63  ;;  %v1200_v12 = vmul.f32 0.5, %v1974_v2 }
 0x23c   : > { %1977 = vtanh.f32 %v1142_v0  ;;  %v2763_v24 = vadd.f32 0.5, %v1199_v6 }
 0x23d   : > { %v2767_v26 = vadd.f32 0.5, %v1200_v12 }
 0x23e   : > { %v1058_v3 = vpop.f32.mrf.mxu2 }
 0x23f   : > { %v1059_v4 = vadd.f32 %v1058_v3, %v918_v37  ;;  %v1106_v5 = vpop.f32.mrf.mxu3 }
 0x240   : > { %v1107_v7 = vadd.f32 %v1106_v5, %v918_v37 }
 0x241   : > { %v1976_v9 = vpop.eup %1975  ;;  %v1143_v22 = vmul.f32 0.5, %v1059_v4 }
 0x242   : > { %v1978_v13 = vpop.eup %1977  ;;  %v1201_v14 = vmul.f32 0.5, %v1976_v9  ;;  %v1144_v23 = vmul.f32 0.5, %v1107_v7 }
 0x243   : > { %v1202_v21 = vmul.f32 0.5, %v1978_v13  ;;  %1979 = vtanh.f32 %v1143_v22 }
 0x244   : > { %v2765_v25 = vadd.f32 0.5, %v1201_v14  ;;  %1981 = vtanh.f32 %v1144_v23 }
 0x245   : > { %v2769_v28 = vadd.f32 0.5, %v1202_v21 }
 0x246   : > { %v1060_v29 = vpop.f32.mrf.mxu2  ;;  %v1261_v30 = vpack.c.bf16 %v2765_v25, %v2763_v24  ;;  %v1746_v24 = vld [vmem:[%s2919_s5 + $0x8] sm:$0xff] }
 0x247   : > { %v1061_v31 = vadd.f32 %v1060_v29, %v2745_v19  ;;  %v1108_v32 = vpop.f32.mrf.mxu3  ;;  %v1262_v33 = vpack.c.bf16 %v2769_v28, %v2767_v26  ;;  %v1292_v28 = vpop.permute.xlu1 %1291 }
 0x248   : > { %v1109_v34 = vadd.f32 %v1108_v32, %v2745_v19 }
 0x249   : > { %v1145_v35 = vmul.f32 0.5, %v1061_v31  ;;  %v1980_v37 = vpop.eup %1979 }
 0x24a   : > { %v1146_v36 = vmul.f32 0.5, %v1109_v34  ;;  %v1982_v38 = vpop.eup %1981  ;;  %v1203_v42 = vmul.f32 0.5, %v1980_v37 }
 0x24b   : > { %1983 = vtanh.f32 %v1145_v35  ;;  %v1204_v45 = vmul.f32 0.5, %v1982_v38 }
 0x24c   : > { %1985 = vtanh.f32 %v1146_v36  ;;  %v2779_v50 = vadd.f32 0.5, %v1203_v42 }
 0x24d   : > { %v2783_v56 = vadd.f32 0.5, %v1204_v45 }
 0x24e   : > { %v1063_v39 = vpop.f32.mrf.mxu2 }
 0x24f   : > { %v1064_v40 = vadd.f32 %v1063_v39, %v2737_v16  ;;  %v1111_v41 = vpop.f32.mrf.mxu3  ;;  %v1287_v55 = vpop.permute.xlu1 %1286 }
 0x250   : > { %v1112_v43 = vadd.f32 %v1111_v41, %v2737_v16 }
 0x251   : > { %v1984_v44 = vpop.eup %1983  ;;  %v1147_v49 = vmul.f32 0.5, %v1064_v40 }
 0x252   : > { %v1986_v46 = vpop.eup %1985  ;;  %v1205_v47 = vmul.f32 0.5, %v1984_v44  ;;  %v1148_v19 = vmul.f32 0.5, %v1112_v43 }
 0x253   : > { %v1206_v48 = vmul.f32 0.5, %v1986_v46  ;;  %1987 = vtanh.f32 %v1147_v49 }
 0x254   : > { %v2781_v51 = vadd.f32 0.5, %v1205_v47  ;;  %1989 = vtanh.f32 %v1148_v19 }
 0x255   : > { %v2785_v57 = vadd.f32 0.5, %v1206_v48 }
 0x256   : > { %v1065_v59 = vpop.f32.mrf.mxu2  ;;  %v1263_v60 = vpack.c.bf16 %v2781_v51, %v2779_v50 }
 0x257   : > { %v1066_v16 = vadd.f32 %v1065_v59, %v2743_v18  ;;  %v1113_v62 = vpop.f32.mrf.mxu3  ;;  %v1264_v63 = vpack.c.bf16 %v2785_v57, %v2783_v56 }
 0x258   : > { %v1114_v0 = vadd.f32 %v1113_v62, %v2743_v18 }
 0x259   : > { %v1149_v1 = vmul.f32 0.5, %v1066_v16  ;;  %v1988_v3 = vpop.eup %1987 }
 0x25a   : > { %v1150_v2 = vmul.f32 0.5, %v1114_v0  ;;  %v1990_v4 = vpop.eup %1989  ;;  %v1207_v7 = vmul.f32 0.5, %v1988_v3 }
 0x25b   : > { %1991 = vtanh.f32 %v1149_v1  ;;  %v1208_v12 = vmul.f32 0.5, %v1990_v4 }
 0x25c   : > { %1993 = vtanh.f32 %v1150_v2  ;;  %v2793_v22 = vadd.f32 0.5, %v1207_v7 }
 0x25d   : > { %v2797_v29 = vadd.f32 0.5, %v1208_v12 }
 0x25e   : > { %v1068_v5 = vpop.f32.mrf.mxu2 }
 0x25f   : > { %v1116_v6 = vpop.f32.mrf.mxu3 }
 0x261   : > { %v1992_v9 = vpop.eup %1991 }
 0x262   : > { %v1994_v13 = vpop.eup %1993  ;;  %v1209_v14 = vmul.f32 0.5, %v1992_v9 }
 0x263   : > { %v1210_v21 = vmul.f32 0.5, %v1994_v13 }
 0x264   : > { %v2795_v23 = vadd.f32 0.5, %v1209_v14  ;;  %v1069_v14 = vadd.f32 %v1068_v5, %v2735_v15 }
 0x265   : > { %v2799_v18 = vadd.f32 0.5, %v1210_v21 }
 0x266   : > { %v1070_v31 = vpop.f32.mrf.mxu2  ;;  %v1265_v32 = vpack.c.bf16 %v2795_v23, %v2793_v22  ;;  %v1745_v22 = vld [vmem:[%s2919_s5] sm:$0xff] }
 0x267   : > { %v1118_v34 = vpop.f32.mrf.mxu3  ;;  %v1266_v35 = vpack.c.bf16 %v2799_v18, %v2797_v29  ;;  %v1071_v7 = vadd.f32 %v1070_v31, %v2749_v27 }
 0x26e   : > { %v1073_v36 = vpop.f32.mrf.mxu2 }
 0x26f   : > { %v1121_v37 = vpop.f32.mrf.mxu3  ;;  %v1074_v2 = vadd.f32 %v1073_v36, %v2747_v20 }
 0x271   : > { %v1155_v21 = vmul.f32 0.5, %v1074_v2 }
 0x276   : > { %v1075_v38 = vpop.f32.mrf.mxu2 }
 0x277   : > { %v1123_v39 = vpop.f32.mrf.mxu3  ;;  %v1076_v19 = vadd.f32 %v1075_v38, %v2730_v11 }
 0x278   : > { %v1124_v62 = vadd.f32 %v1123_v39, %v2730_v11  ;;  %v1119_v11 = vadd.f32 %v1118_v34, %v2749_v27  ;;  %v1151_v27 = vmul.f32 0.5, %v1069_v14 }
 0x279   : > { %v1157_v9 = vmul.f32 0.5, %v1076_v19 }
 0x27a   : > { %v1158_v13 = vmul.f32 0.5, %v1124_v62  ;;  %v1154_v39 = vmul.f32 0.5, %v1119_v11 }
 0x27e   : > { %v1078_v40 = vpop.f32.mrf.mxu2 }
 0x27f   : > { %v1126_v41 = vpop.f32.mrf.mxu3  ;;  %v1079_v44 = vadd.f32 %v1078_v40, %v2721_v8 }
 0x280   : > { %v1127_v48 = vadd.f32 %v1126_v41, %v2721_v8 }
 0x281   : > { %v1159_v47 = vmul.f32 0.5, %v1079_v44 }
 0x282   : > { %v1160_v4 = vmul.f32 0.5, %v1127_v48 }
 0x283   : > { %1995 = vtanh.f32 %v1159_v47 }
 0x286   : > { %v1080_v42 = vpop.f32.mrf.mxu2 }
 0x287   : > { %v1128_v43 = vpop.f32.mrf.mxu3  ;;  %v1081_v45 = vadd.f32 %v1080_v42, %v2728_v10 }
 0x288   : > { %v1129_v46 = vadd.f32 %v1128_v43, %v2728_v10  ;;  %v1122_v10 = vadd.f32 %v1121_v37, %v2747_v20  ;;  %v1153_v37 = vmul.f32 0.5, %v1071_v7 }
 0x289   : > { %v1161_v49 = vmul.f32 0.5, %v1081_v45  ;;  %v1996_v20 = vpop.eup %1995 }
 0x28a   : > { %v1162_v59 = vmul.f32 0.5, %v1129_v46  ;;  %v1156_v36 = vmul.f32 0.5, %v1122_v10 }
 0x28b   : > { %1997 = vtanh.f32 %v1161_v49  ;;  %v1219_v49 = vmul.f32 0.5, %v1996_v20 }
 0x28c   : > { %1999 = vtanh.f32 %v1162_v59 }
 0x28e   : > { %v1083_v16 = vpop.f32.mrf.mxu2 }
 0x28f   : > { %v1084_v0 = vadd.f32 %v1083_v16, %v2741_v17  ;;  %v1131_v1 = vpop.f32.mrf.mxu3 }
 0x290   : > { %v1132_v3 = vadd.f32 %v1131_v1, %v2741_v17  ;;  %v1117_v17 = vadd.f32 %v1116_v6, %v2735_v15 }
 0x291   : > { %v1163_v8 = vmul.f32 0.5, %v1084_v0  ;;  %v1998_v31 = vpop.eup %1997 }
 0x292   : > { %v1164_v12 = vmul.f32 0.5, %v1132_v3  ;;  %v2000_v41 = vpop.eup %1999  ;;  %v1152_v42 = vmul.f32 0.5, %v1117_v17  ;;  %v1221_v6 = vmul.f32 0.5, %v1998_v31 }
 0x293   : > { %2001 = vtanh.f32 %v1163_v8  ;;  %v1222_v46 = vmul.f32 0.5, %v2000_v41 }
 0x294   : > { %2003 = vtanh.f32 %v1164_v12  ;;  %v1251_v3 = vadd.f32 0.5, %v1221_v6 }
 0x295   : > { %2005 = vtanh.f32 %v1160_v4  ;;  %v1252_v7 = vadd.f32 0.5, %v1222_v46 }
 0x296   : > { %2007 = vtanh.f32 %v1157_v9  ;;  %v1085_v38 = vpop.f32.mrf.mxu2 }
 0x297   : > { %2009 = vtanh.f32 %v1158_v13  ;;  %v1133_v40 = vpop.f32.mrf.mxu3  ;;  %v1249_v13 = vadd.f32 0.5, %v1219_v49 }
 0x298   : > { %2011 = vtanh.f32 %v1155_v21 }
 0x299   : > { %v2002_v34 = vpop.eup %2001  ;;  %2013 = vtanh.f32 %v1156_v36 }
 0x29a   : > { %v2004_v5 = vpop.eup %2003  ;;  %2015 = vtanh.f32 %v1153_v37  ;;  %v1223_v43 = vmul.f32 0.5, %v2002_v34  ;;  %v1271_v37 = vpack.c.bf16 %v1251_v3, %v1249_v13 }
 0x29b   : > { %v2006_v15 = vpop.eup %2005  ;;  %2017 = vtanh.f32 %v1154_v39  ;;  %v1224_v44 = vmul.f32 0.5, %v2004_v5 }
 0x29c   : > { %v2008_v45 = vpop.eup %2007  ;;  %2019 = vtanh.f32 %v1151_v27  ;;  %v1253_v47 = vadd.f32 0.5, %v1223_v43  ;;  %v1220_v16 = vmul.f32 0.5, %v2006_v15 }
 0x29d   : > { %v2010_v48 = vpop.eup %2009  ;;  %2021 = vtanh.f32 %v1152_v42  ;;  %v1254_v19 = vadd.f32 0.5, %v1224_v44  ;;  %v1217_v1 = vmul.f32 0.5, %v2008_v45 }
 0x29e   : > { %v2012_v59 = vpop.eup %2011  ;;  %v1273_v62 = vpack.c.bf16 %v1253_v47, %v1253_v47  ;;  %v1218_v4 = vmul.f32 0.5, %v2010_v48  ;;  %v1250_v17 = vadd.f32 0.5, %v1220_v16 }
 0x29f   : > { %v2014_v0 = vpop.eup %2013  ;;  %v1274_v2 = vpack.c.bf16 %v1254_v19, %v1254_v19  ;;  %v1215_v12 = vmul.f32 0.5, %v2012_v59  ;;  %v1247_v38 = vadd.f32 0.5, %v1217_v1 }
 0x2a0   : > { %v2016_v10 = vpop.eup %2015  ;;  %v1318_v8 = vsel %vm1316_vm3, %v1273_v62, 0  ;;  %v1216_v21 = vmul.f32 0.5, %v2014_v0  ;;  %v1272_v39 = vpack.c.bf16 %v1252_v7, %v1250_v17  ;;  %v1248_v40 = vadd.f32 0.5, %v1218_v4 }
 0x2a1   : > { %v2018_v9 = vpop.eup %2017  ;;  %1323 = vmatpush.bf16.msrb.mxu0 %v1318_v8  ;;  %v1321_v11 = vsel %vm1316_vm3, %v1274_v2, 0  ;;  %v1213_v20 = vmul.f32 0.5, %v2016_v10  ;;  %v1245_v27 = vadd.f32 0.5, %v1215_v12 }
 0x2a2   : > { %v2020_v14 = vpop.eup %2019  ;;  %1342 = vmatpush.bf16.msrb.mxu1 %v1321_v11  ;;  %v1214_v31 = vmul.f32 0.5, %v2018_v9  ;;  %v1246_v42 = vadd.f32 0.5, %v1216_v21 }
 0x2a3   : > { %v2022_v36 = vpop.eup %2021  ;;  %v1211_v41 = vmul.f32 0.5, %v2020_v14  ;;  %v1269_v5 = vpack.c.bf16 %v1247_v38, %v1245_v27  ;;  %v1243_v43 = vadd.f32 0.5, %v1213_v20 }
 0x2a4   : > { %v1212_v34 = vmul.f32 0.5, %v2022_v36  ;;  %v1270_v15 = vpack.c.bf16 %v1248_v40, %v1246_v42  ;;  %v1244_v6 = vadd.f32 0.5, %v1214_v31 }
 0x2a5   : > { %1324 = vmatpush.bf16.msrb.mxu0 %v1271_v37  ;;  %v1241_v44 = vadd.f32 0.5, %v1211_v41 }
 0x2a6   : > { %1343 = vmatpush.bf16.msrb.mxu1 %v1272_v39  ;;  %v1242_v45 = vadd.f32 0.5, %v1212_v34 }
 0x2a7   : > { %v1267_v46 = vpack.c.bf16 %v1243_v43, %v1241_v44 }
 0x2a8   : > { %v1268_v47 = vpack.c.bf16 %v1244_v6, %v1242_v45 }
 0x2a9   : > { %1325 = vmatpush.bf16.msrb.mxu0 %v1269_v5 }
 0x2aa   : > { %1344 = vmatpush.bf16.msrb.mxu1 %v1270_v15  ;;  %v1393_v15 = vld [vmem:[%s2921_s7] sm:$0x1] }
 0x2ad   : > { %1326 = vmatpush.bf16.msrb.mxu0 %v1267_v46 }
 0x2ae   : > { %1345 = vmatpush.bf16.msrb.mxu1 %v1268_v47 }
 0x2b1   : > { %1327 = vmatpush.bf16.msrb.mxu0 %v1265_v32  ;;  %v1297_v32 = vpop.permute.xlu2 %1296 }
 0x2b2   : > { %1346 = vmatpush.bf16.msrb.mxu1 %v1266_v35 }
 0x2b5   : > { %1328 = vmatpush.bf16.msrb.mxu0 %v1263_v60 }
 0x2b6   : > { %1347 = vmatpush.bf16.msrb.mxu1 %v1264_v63 }
 0x2b9   : > { %1329 = vmatpush.bf16.msrb.mxu0 %v1261_v30  ;;  %v1402_v6 = vpop.permute.xlu2 %1401 }
 0x2ba   : > { %1348 = vmatpush.bf16.msrb.mxu1 %v1262_v33  ;;  %v1404_v44 = vperm.slane %v1402_v6, 0 }
 0x2bd   : > { %1330 = vmatpush.bf16.msrb.mxu0 %v1259_v58 }
 0x2be   : > { %1349 = vmatpush.bf16.msrb.mxu1 %v1260_v61 }
 0x2c0   : > { %1723 = vmatmul.msk.bf16.vlgmr.msrb.gmra.mxu0 %vm1309_vm4, %v1745_v22 }
 0x2c1   : > { %1725 = vmatmul.msk.bf16.vlgmr.msrb.gmra.mxu1 %vm1309_vm4, %v1745_v22 }
 0x2d0   : > { %1724 = vmatmul.msk.bf16.gmra.mxu0 %vm1309_vm4, %v1746_v24 }
 0x2d1   : > { %1726 = vmatmul.msk.bf16.gmra.mxu1 %vm1309_vm4, %v1746_v24 }
 0x33d   : > { %v1332_v25 = vpop.f32.mrf.mxu0 }
 0x33e   : > { %v1351_v26 = vpop.f32.mrf.mxu1  ;;  %v1333_v53 = vadd.f32 %v1332_v25, %v1282_v52 }
 0x33f   : > { %v1352_v58 = vadd.f32 %v1351_v26, %v1282_v52 }
 0x340   : > { %v1361_v56 = vmul.f32 0.5, %v1333_v53 }
 0x341   : > { %v1362_v60 = vmul.f32 0.5, %v1352_v58  ;;  %v1448_v58 = vlaneseq }
 0x342   : > { %2023 = vtanh.f32 %v1361_v56 }
 0x343   : > { %2025 = vtanh.f32 %v1362_v60  ;;  %vm1450_vm6 = vcmp.lt.s32.totalorder %v1448_v58, 256 }
 0x345   : > { %v1334_v30 = vpop.f32.mrf.mxu0 }
 0x346   : > { %v1353_v33 = vpop.f32.mrf.mxu1  ;;  %v1335_v57 = vadd.f32 %v1334_v30, %v1287_v55 }
 0x347   : > { %v1354_v63 = vadd.f32 %v1353_v33, %v1287_v55 }
 0x348   : > { %v1363_v18 = vmul.f32 0.5, %v1335_v57  ;;  %v2024_v0 = vpop.eup %2023 }
 0x349   : > { %v1364_v35 = vmul.f32 0.5, %v1354_v63  ;;  %v2026_v1 = vpop.eup %2025  ;;  %v1377_v17 = vmul.f32 0.5, %v2024_v0 }
 0x34a   : > { %v1378_v37 = vmul.f32 0.5, %v2026_v1 }
 0x34b   : > { %v1385_v34 = vadd.f32 0.5, %v1377_v17 }
 0x34c   : > { %v1386_v42 = vadd.f32 0.5, %v1378_v37 }
 0x34d   : > { %v1337_v50 = vpop.f32.mrf.mxu0 }
 0x34e   : > { %v1338_v51 = vadd.f32 %v1337_v50, %v1292_v28  ;;  %v1356_v54 = vpop.f32.mrf.mxu1 }
 0x34f   : > { %v1357_v61 = vadd.f32 %v1356_v54, %v1292_v28 }
 0x350   : > { %v1365_v23 = vmul.f32 0.5, %v1338_v51 }
 0x351   : > { %v1366_v29 = vmul.f32 0.5, %v1357_v61 }
 0x352   : > { %2027 = vtanh.f32 %v1365_v23 }
 0x353   : > { %2029 = vtanh.f32 %v1366_v29 }
 0x354   : > { %2031 = vtanh.f32 %v1363_v18 }
 0x355   : > { %v1339_v48 = vpop.f32.mrf.mxu0  ;;  %2033 = vtanh.f32 %v1364_v35 }
 0x356   : > { %v1340_v49 = vadd.f32 %v1339_v48, %v1297_v32  ;;  %v1358_v19 = vpop.f32.mrf.mxu1 }
 0x357   : > { %v1359_v59 = vadd.f32 %v1358_v19, %v1297_v32 }
 0x358   : > { %v1367_v16 = vmul.f32 0.5, %v1340_v49  ;;  %v2028_v2 = vpop.eup %2027 }
 0x359   : > { %v1368_v62 = vmul.f32 0.5, %v1359_v59  ;;  %v2030_v3 = vpop.eup %2029  ;;  %v1381_v8 = vmul.f32 0.5, %v2028_v2 }
 0x35a   : > { %2035 = vtanh.f32 %v1367_v16  ;;  %v2032_v10 = vpop.eup %2031  ;;  %v1382_v9 = vmul.f32 0.5, %v2030_v3 }
 0x35b   : > { %2037 = vtanh.f32 %v1368_v62  ;;  %v2034_v4 = vpop.eup %2033  ;;  %v1379_v11 = vmul.f32 0.5, %v2032_v10  ;;  %v1389_v36 = vadd.f32 0.5, %v1381_v8 }
 0x35c   : > { %v1380_v14 = vmul.f32 0.5, %v2034_v4  ;;  %v1390_v38 = vadd.f32 0.5, %v1382_v9 }
 0x35d   : > { %v1387_v39 = vadd.f32 0.5, %v1379_v11 }
 0x35e   : > { %v1388_v41 = vadd.f32 0.5, %v1380_v14 }
 0x35f   : > { %v1394_v5 = vpack.c.bf16 %v1387_v39, %v1385_v34 }
 0x360   : > { %v2036_v7 = vpop.eup %2035  ;;  %v1395_v43 = vpack.c.bf16 %v1388_v41, %v1386_v42 }
 0x361   : > { %v2038_v12 = vpop.eup %2037  ;;  %v1383_v13 = vmul.f32 0.5, %v2036_v7 }
 0x362   : > { %v1384_v21 = vmul.f32 0.5, %v2038_v12 }
 0x363   : > { %v1391_v20 = vadd.f32 0.5, %v1383_v13 }
 0x364   : > { %v1392_v31 = vadd.f32 0.5, %v1384_v21 }
 0x365   : > { %v1396_v40 = vpack.c.bf16 %v1391_v20, %v1389_v36 }
 0x366   : > { %v1397_v27 = vpack.c.bf16 %v1392_v31, %v1390_v38 }
 0x367   : > { %1415 = vmatpush.bf16.msra.mxu0 %v1396_v40 }
 0x368   : > { %1428 = vmatpush.bf16.msra.mxu1 %v1397_v27 }
 0x36b   : > { %1416 = vmatpush.bf16.msra.mxu0 %v1394_v5 }
 0x36c   : > { %1429 = vmatpush.bf16.msra.mxu1 %v1395_v43 }
 0x36e   : > { %1727 = vmatmul.msk.bf16.vlgmr.msra.gmra.mxu0 %vm1405_vm5, %v1393_v15 }
 0x36f   : > { %1728 = vmatmul.msk.bf16.vlgmr.msra.gmra.mxu1 %vm1405_vm5, %v1393_v15 }
 0x3eb   : > { %v1418_v45 = vpop.f32.mrf.mxu0 }
 0x3ec   : > { %v1419_v46 = vadd.f32 %v1418_v45, %v1404_v44  ;;  %v1431_v47 = vpop.f32.mrf.mxu1 }
 0x3ed   : > { %v1432_v22 = vadd.f32 %v1431_v47, %v1404_v44 }
 0x3ee   : > { %v1435_v24 = vmul.f32 0.5, %v1419_v46 }
 0x3ef   : > { %v1436_v25 = vmul.f32 0.5, %v1432_v22 }
 0x3f0   : > { %2039 = vtanh.f32 %v1435_v24 }
 0x3f1   : > { %2041 = vtanh.f32 %v1436_v25 }
 0x3f3   : > { %v1420_v26 = vpop.f32.mrf.mxu0 }
 0x3f4   : > { %v1433_v28 = vpop.f32.mrf.mxu1 }
 0x3f6   : > { %v2040_v30 = vpop.eup %2039 }
 0x3f7   : > { %v2042_v33 = vpop.eup %2041  ;;  %v1439_v52 = vmul.f32 0.5, %v2040_v30 }
 0x3f8   : > { %v1440_v53 = vmul.f32 0.5, %v2042_v33 }
 0x3f9   : > { %v1441_v51 = vadd.f32 0.5, %v1439_v52 }
 0x3fa   : > { %v1442_v50 = vadd.f32 0.5, %v1440_v53 }
 0x3fb   : > { %1460 = sbr.rel (!%p2341_p6) target bundleno = 1053 (0x41d), region = 126 }
 0x3fc   : > { %v1445_v54 = vrot.slane %v1442_v50, 7 }
 0x3fe   : > { %v1446_v55 = vsel %vm738_vm0, %v1441_v51, %v1445_v54 }
 0x3ff   : > { %1452 = vst.msk [vmem:[%s637_s18] sm:$0x3] %vm1450_vm6, %v1446_v55 }
 0x400   : > { %s2967_s17 = smov (!%p1463_p7, %s1462_s17), 2 }
 0x401   : > { %s1465_s26 = ssub.s32 2, %s2967_s17 }
 0x402   : > { %s1466_s30 = sshll.u32 %s1465_s26, 4 }
 0x403   : > { %1467 = vsyncadd %s1454_s0, %s1466_s30  ;;  %p1731_p10 = scmp.ne.s32.totalorder %s2967_s17, 0  ;;  %s1469_s19 = scalar_lea.hbm %s2923_s9, %s1730_s21 }
 0x404   : > { %s1470_s15 = sshll.u32 %s2967_s17, 4  ;;  %s1471_s22 = sshll.u32 %s637_s18, 4  ;;  %s2871_s22 = int_to_ptr.vmem [resolvable:$true] %s1471_s22 }
 0x405   : > { %s2873_s13 = sshll.u32 %s1469_s19, 4  ;;  %s2043_s8 = sshra.s32 %s2871_s22, 4  ;;  %s1474_s13 = int_to_ptr.hbm [resolvable:$true] %s2873_s13  ;;  %s2044_s8 = int_to_ptr.vmem [resolvable:$true] %s2043_s8 }
 0x406   : > { %s2045_s25 = sshrl.u32 %s1470_s15, 4  ;;  %s2249_s23 = smov [#allocation4]  }
 0x407   : > { %s2050_s27 = scalar_lea.vmem %s2044_s8, %s2045_s25  ;;  %s2054_s24 = scalar_lea.vmem %s2249_s23, 4 }
 0x408   : > { %p2051_p6 = scmp.ne.s32.totalorder %s2044_s8, %s2050_s27  ;;  %p2056_p13 = scmp.lt.s32.totalorder %s2054_s24, %s2050_s27 }
 0x40a   : > { %p2052_p11 = pnand %p2051_p6, %p1731_p10 }
 0x40c   : > { %p2053_p12 = pneg %p2052_p11 }
 0x40e   : > { %p2058_p0 = pnand %p2056_p13, %p2053_p12 }
 0x410   : > { %2061 = shalt.err (!%p2058_p0)
}
 0x411   : > { %s2062_s28 = sshra.s32 %s1474_s13, 4  ;;  %s2073_s26 = scalar_lea.hbm %s2923_s9, 3  ;;  %s2063_s28 = int_to_ptr.hbm [resolvable:$true] %s2062_s28 }
 0x412   : > { %s2069_s18 = scalar_lea.hbm %s2063_s28, %s2045_s25  ;;  %p2074_p4 = scmp.lt.s32.totalorder %s2063_s28, %s2923_s9 }
 0x413   : > { %p2070_p1 = scmp.ne.s32.totalorder %s2063_s28, %s2069_s18  ;;  %p2075_p5 = scmp.lt.s32.totalorder %s2073_s26, %s2069_s18 }
 0x415   : > { %p2071_p2 = pnand %p2070_p1, %p1731_p10  ;;  %p2076_p7 = por %p2075_p5, %p2074_p4 }
 0x417   : > { %p2072_p3 = pneg %p2071_p2 }
 0x419   : > { %p2077_p6 = pnand %p2076_p7, %p2072_p3 }
 0x41b   : > { %2080 = shalt.err (!%p2077_p6)
}
 0x41c   : > { %1476 = dma.vmem_to_hbm [thread:$0]  (%p1731_p10), %s2871_s22, %s1470_s15, %s1474_s13, %s1454_s0  }
 0x41d PF: > { %s1485_s19 = sand.u32 1, %s2168_s11   ;;  %p1751_p11 = pnand %p1627_p9, %p2345_p8 }
 0x41e   : > { %s1486_s8 = scalar_lea.sflag [#allocation5], %s1485_s19 }
 0x41f   : > { %p1752_p12 = pneg %p1751_p11 }
 0x421   : > { %2163 = dma.done.wait (%p1752_p12), %s1486_s8, 32  }
 0x422   : > { %2165 = vsyncadd (%p1752_p12), %s1486_s8, 4294967264  ;;  %s2951_s14 = sld [smem:[#allocation8_spill]]  ;;  %s2954_s11 = smov %s2172_s12 }
 0x423   : > { %s2952_s10 = sld [smem:[#allocation7_spill]] }
 0x424   : > { %s2953_s13 = sld [smem:[#allocation9_spill]] }
 0x428   : > { %p21_p13 = scmp.ge.s32.totalorder %s2951_s14, 4  }
 0x429   : > { %s2955_s12 = smov %s2952_s10 }
 0x42a   :  { %23 = sbr.rel (!%p21_p13) target bundleno = 6 (0x6), region = 224 }
 0x42f   :  { %1492 = vsyncpa [#allocation5], 1 }
 0x430   :  { %1494 = vsyncpa [#allocation5 + $0x1], 1 }

</bundles_post_ra>
